<compile_context>
chip_gen: v7x
topology: tpu7x:2x2x1
jax: 0.10.0
libtpu: 0.0.40
codegen_flags: <defaults>
</compile_context>

<pallas_src>
import functools
from dataclasses import dataclass
from typing import List

import jax
import jax.numpy as jnp
from jax.experimental import pallas as pl
from jax.experimental.pallas import tpu as pltpu


# ------------------------------------------------------------------ utilities

def _round_up(x, m):
    return ((x + m - 1) // m) * m


def _apply_activation(y, activation):
    if activation == "relu":
        return jnp.maximum(y, 0.0)            # == y * (y > 0)
    elif activation == "tanh":
        return jnp.tanh(y)                    # single EUP op, overflow-safe
    elif activation == "sigmoid":
        return jax.nn.sigmoid(y)              # stable 1 / (1 + exp(-y))
    elif activation == "none":
        return y
    raise ValueError("Activation function not supported")


# --------------------------------------------------- hardware-aware VMEM sizes

def _vmem_capacity_bytes():
    try:
        return int(pltpu.get_tpu_info().vmem_capacity_bytes)
    except Exception:
        return 64 * 1024 * 1024      # conservative (v7x per-TC VMEM)


_VMEM_CAPACITY = _vmem_capacity_bytes()
# Budget for resident weights + activation tiles on the fused path
# (~45 MiB on v7x's 64 MiB, ~90 MiB on v5e/v6e's 128 MiB).
_FUSED_VMEM_BUDGET = int(_VMEM_CAPACITY * 0.70)
# Raise the scoped VMEM limit (default is only 16/32 MiB) but stay below physical.
_VMEM_LIMIT_BYTES = int(_VMEM_CAPACITY * 0.90)

_HAS_BUFFERED = hasattr(pl, "Buffered")


# ----------------------------------------------------- prepared (padded) params

@dataclass
class PreparedMLPParams:
    """Weights pre-padded/transposed ONCE into the kernel layout.

    weights[l]: [in_pad_l, out_pad_l] in compute_dtype (zero-padded rows/cols)
    biases[l] : [1, out_pad_l] float32 (zero-padded lanes)
    """
    weights: List[jax.Array]
    biases: List[jax.Array]
    in_features: List[int]
    out_features: List[int]
    in_pad: List[int]
    out_pad: List[int]
    compute_dtype: object


def prepare_mlp_params(params, input_size, compute_dtype=jnp.bfloat16):
    """Hoisted weight preprocessing: pad to 128-lane multiples and transpose."""
    sizes = [input_size] + [w.shape[0] for (w, _) in params]
    padded = [_round_up(s, 128) for s in sizes]
    weights, biases = [], []
    for l, (w, b) in enumerate(params):
        out_f, in_f = w.shape
        assert in_f == sizes[l] and out_f == sizes[l + 1]
        w_t = (jnp.zeros((padded[l], padded[l + 1]), jnp.float32)
               .at[:in_f, :out_f].set(w.T))                        # [in, out]
        weights.append(w_t.astype(compute_dtype))
        biases.append(jnp.zeros((1, padded[l + 1]), jnp.float32).at[0, :out_f].set(b))
    return PreparedMLPParams(
        weights=weights, biases=biases,
        in_features=sizes[:-1], out_features=sizes[1:],
        in_pad=padded[:-1], out_pad=padded[1:],
        compute_dtype=compute_dtype)


# ------------------------------------------------- fused whole-MLP kernel

def _mlp_fused_kernel(x_ref, *refs, num_layers, activation):
    """x_ref: [tm, in_pad]; refs = (w0, b0, ..., wL-1, bL-1, o_ref)."""
    o_ref = refs[-1]
    h = x_ref[...]                                  # f32 activations
    for l in range(num_layers):
        w_ref = refs[2 * l]
        b = refs[2 * l + 1][...]                    # f32 bias
        # bf16 (or f32) MXU inputs, f32 accumulator.
        y = jnp.dot(h.astype(w_ref.dtype), w_ref[...],
                    preferred_element_type=jnp.float32) + b
        if l < num_layers - 1:
            y = _apply_activation(y, activation)
        h = y
    o_ref[...] = h.astype(o_ref.dtype)


def _pick_batch_tile(B):
    if B >= 512:
        return 256          # matches 256x256 MXU, grid >= 2 for megacore
    if B >= 128:
        return 128          # grid >= 2 whenever B >= 256
    return _round_up(max(B, 1), 8)


def _resident_spec(shape, single_buffer):
    """Constant-index (resident) block; request 1 buffer to avoid doubling VMEM."""
    if single_buffer and _HAS_BUFFERED:
        try:
            return pl.BlockSpec(shape, lambda i: (0, 0),
                                pipeline_mode=pl.Buffered(1))
        except TypeError:
            pass
    return pl.BlockSpec(shape, lambda i: (0, 0))


def _fused_footprint_bytes(prepared, tm):
    wbytes = sum(w.size * w.dtype.itemsize for w in prepared.weights)
    bbytes = sum(b.size * b.dtype.itemsize for b in prepared.biases)
    max_dim = max(prepared.in_pad + prepared.out_pad)
    act_bytes = 6 * tm * max_dim * 4        # in/out tiles (double-buffered) + temps
    return wbytes + bbytes + act_bytes


def _mlp_forward_fused(x, prepared, activation):
    """x: [B, in_features] f32, prepared: PreparedMLPParams."""
    B = x.shape[0]
    num_layers = len(prepared.weights)
    in_pad0, out_pad_last = prepared.in_pad[0], prepared.out_pad[-1]

    tm = _pick_batch_tile(B)
    b_pad = _round_up(B, tm)

    # Only the activation is padded per call; weights were prepared once.
    x_p = (jnp.zeros((b_pad, in_pad0), jnp.float32)
           .at[:B, :prepared.in_features[0]].set(x))

    operands = [x_p]
    for w, b in zip(prepared.weights, prepared.biases):
        operands += [w, b]

    kernel = functools.partial(
        _mlp_fused_kernel, num_layers=num_layers, activation=activation)
    out_shape = jax.ShapeDtypeStruct((b_pad, out_pad_last), jnp.float32)
    x_spec = pl.BlockSpec((tm, in_pad0), lambda i: (i, 0))
    out_spec = pl.BlockSpec((tm, out_pad_last), lambda i: (i, 0))

    def run(single_buffer):
        in_specs = [x_spec]
        for w, b in zip(prepared.weights, prepared.biases):
            in_specs.append(_resident_spec(w.shape, single_buffer))
            in_specs.append(_resident_spec(b.shape, single_buffer))
        return pl.pallas_call(
            kernel,
            out_shape=out_shape,
            grid=(b_pad // tm,),
            in_specs=in_specs,
            out_specs=out_spec,
            compiler_params=pltpu.CompilerParams(
                dimension_semantics=("parallel",),
                vmem_limit_bytes=_VMEM_LIMIT_BYTES),
        )(*operands)

    try:
        out = run(single_buffer=True)
    except Exception:
        # Fallback if Buffered(1) pipeline_mode is unsupported on this jax/Mosaic.
        out = run(single_buffer=False)

    return out[:B, :prepared.out_features[-1]]


# ------------------------------------- per-layer tiled fallback (large layers)

def _linear_tiled_kernel(x_ref, w_ref, b_ref, o_ref, acc_ref, *, activation):
    """One (tm, tn) output tile; K is the reduction grid axis (last)."""
    @pl.when(pl.program_id(2) == 0)
    def _():
        acc_ref[...] = jnp.zeros_like(acc_ref)

    acc_ref[...] += jnp.dot(x_ref[...].astype(w_ref.dtype), w_ref[...],
                            preferred_element_type=jnp.float32)

    @pl.when(pl.program_id(2) == pl.num_programs(2) - 1)
    def _():
        y = acc_ref[...] + b_ref[...]
        o_ref[...] = _apply_activation(y, activation).astype(o_ref.dtype)


def _pick_tile(dim, candidates):
    for c in candidates:
        if dim % c == 0:
            return c
    return dim


def _pick_fallback_tm(B):
    if B >= 256:
        return 256
    if B >= 128:
        return 128
    return _round_up(max(B, 1), 8)


def _linear_tiled_padded(x_p, w_p, b_p, activation, *, tm):
    """y_p = act(x_p @ w_p + b_p) entirely in padded layout (no pad/slice here)."""
    m_pad, k_pad = x_p.shape
    k_pad2, n_pad = w_p.shape
    assert k_pad == k_pad2 and m_pad % tm == 0
    tn = _pick_tile(n_pad, (256, 128))
    tk = _pick_tile(k_pad, (512, 256, 128))

    kernel = functools.partial(_linear_tiled_kernel, activation=activation)
    return pl.pallas_call(
        kernel,
        out_shape=jax.ShapeDtypeStruct((m_pad, n_pad), jnp.float32),
        grid_spec=pltpu.PrefetchScalarGridSpec(
            num_scalar_prefetch=0,
            grid=(m_pad // tm, n_pad // tn, k_pad // tk),
            in_specs=[
                pl.BlockSpec((tm, tk), lambda i, j, kk: (i, kk)),
                pl.BlockSpec((tk, tn), lambda i, j, kk: (kk, j)),
                pl.BlockSpec((1, tn), lambda i, j, kk: (0, j)),
            ],
            out_specs=pl.BlockSpec((tm, tn), lambda i, j, kk: (i, j)),
            scratch_shapes=[pltpu.VMEM((tm, tn), jnp.float32)],
        ),
        compiler_params=pltpu.CompilerParams(
            dimension_semantics=("parallel", "parallel", "arbitrary"),
            vmem_limit_bytes=_VMEM_LIMIT_BYTES),
    )(x_p, w_p, b_p)


def _mlp_forward_layerwise(x, prepared, activation):
    """Fallback for huge MLPs: chained tiled matmuls, activations kept padded.

    Padded hidden lanes stay harmless even for sigmoid (activation(0)=0.5)
    because the next layer's padded weight ROWS are zero (see prepare_mlp_params).
    """
    B = x.shape[0]
    tm = _pick_fallback_tm(B)
    m_pad = _round_up(B, tm)
    h = (jnp.zeros((m_pad, prepared.in_pad[0]), jnp.float32)
         .at[:B, :prepared.in_features[0]].set(x))       # pad once
    n = len(prepared.weights)
    for l in range(n):
        act = activation if l < n - 1 else "none"
        h = _linear_tiled_padded(h, prepared.weights[l], prepared.biases[l],
                                 act, tm=tm)
    return h[:B, :prepared.out_features[-1]]             # slice once


def linear_layer_tiled(x, w, b, activation="none", *, compute_dtype=jnp.float32):
    """Standalone y = act(x @ w.T + b) (pads/slices here; for tests/one-offs)."""
    B, in_f = x.shape
    out_f, in_f_w = w.shape
    assert in_f == in_f_w
    tm = _pick_fallback_tm(B)
    m = _round_up(B, tm)
    k = _round_up(in_f, 128)
    n = _round_up(out_f, 128)
    x_p = jnp.zeros((m, k), jnp.float32).at[:B, :in_f].set(x)
    w_p = (jnp.zeros((k, n), jnp.float32).at[:in_f, :out_f].set(w.T)
           .astype(compute_dtype))
    b_p = jnp.zeros((1, n), jnp.float32).at[0, :out_f].set(b)
    out = _linear_tiled_padded(x_p, w_p, b_p, activation, tm=tm)
    return out[:B, :out_f]


# -------------------------------------------------------------- MLP front end

def init_mlp_params(key, input_size, hidden_sizes, num_classes):
    """Xavier-normal weights (std = sqrt(2/(fan_in+fan_out))), zero biases.

    Weights kept in PyTorch layout [out_features, in_features]."""
    assert len(hidden_sizes) > 0, "You should at least have one hidden layer"
    sizes = [input_size] + list(hidden_sizes) + [num_classes]
    params = []
    for in_f, out_f in zip(sizes[:-1], sizes[1:]):
        key, sub = jax.random.split(key)
        std = (2.0 / (in_f + out_f)) ** 0.5
        w = jax.random.normal(sub, (out_f, in_f), dtype=jnp.float32) * std
        b = jnp.zeros((out_f,), dtype=jnp.float32)
        params.append((w, b))
    return params


def mlp_forward(images, params, activation="relu"):
    """images: [B, C, H, W] -> logits: [B, num_classes].

    `params` is ideally a PreparedMLPParams (from prepare_mlp_params, called
    once); a raw [(w, b), ...] list is also accepted and prepared on the fly.
    """
    assert activation in ("relu", "tanh", "sigmoid"), "Invalid choice of activation"
    B = images.shape[0]
    x = images.reshape(B, -1).astype(jnp.float32)   # flatten, like .view(B, -1)

    if not isinstance(params, PreparedMLPParams):
        params = prepare_mlp_params(params, x.shape[1])
    assert x.shape[1] == params.in_features[0]

    tm = _pick_batch_tile(B)
    if _fused_footprint_bytes(params, tm) <= _FUSED_VMEM_BUDGET:
        return _mlp_forward_fused(x, params, activation)

    # TODO(synk): middle path — keep activations resident in VMEM and stream
    # layer weights from HBM (pl.ANY + emit_pipeline) before dropping to
    # per-layer pallas_calls.
    return _mlp_forward_layerwise(x, params, activation)


# ------------------------------------------------------------------ reference

def _activation_ref(activation, y):
    # Mirrors the PyTorch module's activation_fn exactly.
    if activation == "relu":
        return y * (y > 0)
    elif activation == "tanh":
        return (jnp.exp(y) - jnp.exp(-y)) / (jnp.exp(y) + jnp.exp(-y))
    elif activation == "sigmoid":
        return 1.0 / (1.0 + jnp.exp(-y))
    raise ValueError("Activation function not supported")


def mlp_reference(images, params, activation="relu"):
    B = images.shape[0]
    x = images.reshape(B, -1).astype(jnp.float32)
    for (w, b) in params[:-1]:
        x = _activation_ref(activation, x @ w.T + b)
    w_out, b_out = params[-1]
    return x @ w_out.T + b_out


def linear_reference(x, w, b):
    return x @ w.T + b


# ----------------------------------------------------------------------- main

if __name__ == "__main__":
    key = jax.random.PRNGKey(0)

    # Small shapes: batch=2, channels=4, spatial=16 -> input_size = 4*16*16 = 1024
    B, C, H, W = 2, 4, 16, 16
    input_size = C * H * W
    hidden_sizes = [32, 32]
    num_classes = 10

    key, k_img, k_params = jax.random.split(key, 3)
    images = jax.random.normal(k_img, (B, C, H, W), dtype=jnp.float32)
    params = init_mlp_params(k_params, input_size, hidden_sizes, num_classes)

    # Weight pad/transpose hoisted out of the forward path (done ONCE).
    prep_f32 = prepare_mlp_params(params, input_size, compute_dtype=jnp.float32)
    prep_bf16 = prepare_mlp_params(params, input_size, compute_dtype=jnp.bfloat16)

    # Fused-MLP path, all supported activations, f32 (tight) and bf16-MXU (loose).
    for act in ("relu", "tanh", "sigmoid"):
        ref = mlp_reference(images, params, act)

        out_f32 = jax.block_until_ready(mlp_forward(images, prep_f32, act))
        assert out_f32.shape == (B, num_classes)
        assert jnp.allclose(out_f32, ref, atol=1e-4, rtol=1e-4), f"mismatch f32 ({act})"

        out_bf16 = jax.block_until_ready(mlp_forward(images, prep_bf16, act))
        assert out_bf16.shape == (B, num_classes)
        assert jnp.allclose(out_bf16, ref, atol=5e-2, rtol=5e-2), f"mismatch bf16 ({act})"

    # Exercise the per-layer tiled fallback path (padded activations chained
    # between layers, sliced only once at the end).
    x_flat = images.reshape(B, -1)
    out_fb = jax.block_until_ready(_mlp_forward_layerwise(x_flat, prep_f32, "relu"))
    assert jnp.allclose(out_fb, mlp_reference(images, params, "relu"),
                        atol=1e-4, rtol=1e-4), "mismatch (layerwise fallback)"

    # Standalone tiled (M, N, K) linear on a mid-sized layer.
    key, k_x, k_w = jax.random.split(key, 3)
    xt = jax.random.normal(k_x, (16, 512), dtype=jnp.float32)
    wt = jax.random.normal(k_w, (384, 512), dtype=jnp.float32) * (2.0 / 896) ** 0.5
    bt = jnp.zeros((384,), dtype=jnp.float32)
    yt = jax.block_until_ready(linear_layer_tiled(xt, wt, bt, "none"))
    assert jnp.allclose(yt, linear_reference(xt, wt, bt), atol=1e-4, rtol=1e-4), \
        "mismatch (tiled linear)"

    print("KERNEL_OK")
</pallas_src>

<mosaic_0001>
module attributes {stable_mosaic.version = 11 : i64} {
  func.func @_mlp_fused_kernel(%arg0: i32, %arg1: memref<8x1024xf32, #tpu.memory_space<vmem>>, %arg2: memref<1024x128xf32, #tpu.memory_space<vmem>>, %arg3: memref<1x128xf32, #tpu.memory_space<vmem>>, %arg4: memref<128x128xf32, #tpu.memory_space<vmem>>, %arg5: memref<1x128xf32, #tpu.memory_space<vmem>>, %arg6: memref<128x128xf32, #tpu.memory_space<vmem>>, %arg7: memref<1x128xf32, #tpu.memory_space<vmem>>, %arg8: memref<8x128xf32, #tpu.memory_space<vmem>>) attributes {dimension_semantics = [#tpu.dimension_semantics<parallel>], iteration_bounds = array<i64: 1>, scalar_prefetch = 0 : i64, scratch_operands = 0 : i64, tpu.core_type = #tpu.core_type<tc>, window_params = [{transform_indices = @transform_0, window_bounds = array<i64: 8, 1024>}, {pipeline_mode = #tpu.pipeline_mode<synchronous>, transform_indices = @transform_1, window_bounds = array<i64: 1024, 128>}, {pipeline_mode = #tpu.pipeline_mode<synchronous>, transform_indices = @transform_2, window_bounds = array<i64: 1, 128>}, {pipeline_mode = #tpu.pipeline_mode<synchronous>, transform_indices = @transform_3, window_bounds = array<i64: 128, 128>}, {pipeline_mode = #tpu.pipeline_mode<synchronous>, transform_indices = @transform_4, window_bounds = array<i64: 1, 128>}, {pipeline_mode = #tpu.pipeline_mode<synchronous>, transform_indices = @transform_5, window_bounds = array<i64: 128, 128>}, {pipeline_mode = #tpu.pipeline_mode<synchronous>, transform_indices = @transform_6, window_bounds = array<i64: 1, 128>}, {transform_indices = @transform_7, window_bounds = array<i64: 8, 128>}]} {
    %c0 = arith.constant 0 : index
    %c0_0 = arith.constant 0 : index
    %0 = vector.load %arg1[%c0, %c0_0] : memref<8x1024xf32, #tpu.memory_space<vmem>>, vector<8x1024xf32>
    %c0_1 = arith.constant 0 : index
    %c0_2 = arith.constant 0 : index
    %1 = vector.load %arg3[%c0_1, %c0_2] : memref<1x128xf32, #tpu.memory_space<vmem>>, vector<1x128xf32>
    %c0_3 = arith.constant 0 : index
    %c0_4 = arith.constant 0 : index
    %2 = vector.load %arg2[%c0_3, %c0_4] : memref<1024x128xf32, #tpu.memory_space<vmem>>, vector<1024x128xf32>
    %cst = arith.constant dense<0.000000e+00> : vector<8x128xf32>
    %3 = tpu.matmul %0, %2, %cst {dimension_numbers = #tpu.dot_dimension_numbers<[1], [0], [0], [1], [0, 0, 1, 1], [], []>} : vector<8x1024xf32>, vector<1024x128xf32>, vector<8x128xf32> -> vector<8x128xf32>
    %4 = vector.broadcast %1 : vector<1x128xf32> to vector<8x128xf32>
    %5 = arith.addf %3, %4 : vector<8x128xf32>
    %cst_5 = arith.constant 0.000000e+00 : f32
    %6 = vector.broadcast %cst_5 : f32 to vector<8x128xf32>
    %7 = arith.maximumf %5, %6 : vector<8x128xf32>
    %c0_6 = arith.constant 0 : index
    %c0_7 = arith.constant 0 : index
    %8 = vector.load %arg5[%c0_6, %c0_7] : memref<1x128xf32, #tpu.memory_space<vmem>>, vector<1x128xf32>
    %c0_8 = arith.constant 0 : index
    %c0_9 = arith.constant 0 : index
    %9 = vector.load %arg4[%c0_8, %c0_9] : memref<128x128xf32, #tpu.memory_space<vmem>>, vector<128x128xf32>
    %cst_10 = arith.constant dense<0.000000e+00> : vector<8x128xf32>
    %10 = tpu.matmul %7, %9, %cst_10 {dimension_numbers = #tpu.dot_dimension_numbers<[1], [0], [0], [1], [0, 0, 1, 1], [], []>} : vector<8x128xf32>, vector<128x128xf32>, vector<8x128xf32> -> vector<8x128xf32>
    %11 = vector.broadcast %8 : vector<1x128xf32> to vector<8x128xf32>
    %12 = arith.addf %10, %11 : vector<8x128xf32>
    %cst_11 = arith.constant 0.000000e+00 : f32
    %13 = vector.broadcast %cst_11 : f32 to vector<8x128xf32>
    %14 = arith.maximumf %12, %13 : vector<8x128xf32>
    %c0_12 = arith.constant 0 : index
    %c0_13 = arith.constant 0 : index
    %15 = vector.load %arg7[%c0_12, %c0_13] : memref<1x128xf32, #tpu.memory_space<vmem>>, vector<1x128xf32>
    %c0_14 = arith.constant 0 : index
    %c0_15 = arith.constant 0 : index
    %16 = vector.load %arg6[%c0_14, %c0_15] : memref<128x128xf32, #tpu.memory_space<vmem>>, vector<128x128xf32>
    %cst_16 = arith.constant dense<0.000000e+00> : vector<8x128xf32>
    %17 = tpu.matmul %14, %16, %cst_16 {dimension_numbers = #tpu.dot_dimension_numbers<[1], [0], [0], [1], [0, 0, 1, 1], [], []>} : vector<8x128xf32>, vector<128x128xf32>, vector<8x128xf32> -> vector<8x128xf32>
    %18 = vector.broadcast %15 : vector<1x128xf32> to vector<8x128xf32>
    %19 = arith.addf %17, %18 : vector<8x128xf32>
    %c0_17 = arith.constant 0 : index
    %c0_18 = arith.constant 0 : index
    %20 = vector.load %arg8[%c0_17, %c0_18] : memref<8x128xf32, #tpu.memory_space<vmem>>, vector<8x128xf32>
    tpu.vector_store %arg8[%c0_17, %c0_18], %19 {strides = array<i32>} : memref<8x128xf32, #tpu.memory_space<vmem>>, vector<8x128xf32>,
    return
  }
  func.func @transform_0(%arg0: i32) -> (i32, i32) {
    %c0_i32 = arith.constant 0 : i32
    %c0_i32_0 = arith.constant 0 : i32
    return %arg0, %c0_i32 : i32, i32
  }
  func.func @transform_1(%arg0: i32) -> (i32, i32) {
    %c0_i32 = arith.constant 0 : i32
    %c0_i32_0 = arith.constant 0 : i32
    %c0_i32_1 = arith.constant 0 : i32
    return %c0_i32, %c0_i32_0 : i32, i32
  }
  func.func @transform_2(%arg0: i32) -> (i32, i32) {
    %c0_i32 = arith.constant 0 : i32
    %c0_i32_0 = arith.constant 0 : i32
    %c0_i32_1 = arith.constant 0 : i32
    return %c0_i32, %c0_i32_0 : i32, i32
  }
  func.func @transform_3(%arg0: i32) -> (i32, i32) {
    %c0_i32 = arith.constant 0 : i32
    %c0_i32_0 = arith.constant 0 : i32
    %c0_i32_1 = arith.constant 0 : i32
    return %c0_i32, %c0_i32_0 : i32, i32
  }
  func.func @transform_4(%arg0: i32) -> (i32, i32) {
    %c0_i32 = arith.constant 0 : i32
    %c0_i32_0 = arith.constant 0 : i32
    %c0_i32_1 = arith.constant 0 : i32
    return %c0_i32, %c0_i32_0 : i32, i32
  }
  func.func @transform_5(%arg0: i32) -> (i32, i32) {
    %c0_i32 = arith.constant 0 : i32
    %c0_i32_0 = arith.constant 0 : i32
    %c0_i32_1 = arith.constant 0 : i32
    return %c0_i32, %c0_i32_0 : i32, i32
  }
  func.func @transform_6(%arg0: i32) -> (i32, i32) {
    %c0_i32 = arith.constant 0 : i32
    %c0_i32_0 = arith.constant 0 : i32
    %c0_i32_1 = arith.constant 0 : i32
    return %c0_i32, %c0_i32_0 : i32, i32
  }
  func.func @transform_7(%arg0: i32) -> (i32, i32) {
    %c0_i32 = arith.constant 0 : i32
    %c0_i32_0 = arith.constant 0 : i32
    return %arg0, %c0_i32 : i32, i32
  }
}

module attributes {stable_mosaic.version = 11 : i64} {
  func.func @_mlp_fused_kernel(%arg0: i32, %arg1: memref<8x1024xf32, #tpu.memory_space<vmem>>, %arg2: memref<1024x128xf32, #tpu.memory_space<vmem>>, %arg3: memref<1x128xf32, #tpu.memory_space<vmem>>, %arg4: memref<128x128xf32, #tpu.memory_space<vmem>>, %arg5: memref<1x128xf32, #tpu.memory_space<vmem>>, %arg6: memref<128x128xf32, #tpu.memory_space<vmem>>, %arg7: memref<1x128xf32, #tpu.memory_space<vmem>>, %arg8: memref<8x128xf32, #tpu.memory_space<vmem>>) attributes {dimension_semantics = [#tpu.dimension_semantics<parallel>], iteration_bounds = array<i64: 1>, scalar_prefetch = 0 : i64, scratch_operands = 0 : i64, tpu.core_type = #tpu.core_type<tc>, window_params = [{transform_indices = @transform_0, window_bounds = array<i64: 8, 1024>}, {pipeline_mode = #tpu.pipeline_mode<synchronous>, transform_indices = @transform_1, window_bounds = array<i64: 1024, 128>}, {pipeline_mode = #tpu.pipeline_mode<synchronous>, transform_indices = @transform_2, window_bounds = array<i64: 1, 128>}, {pipeline_mode = #tpu.pipeline_mode<synchronous>, transform_indices = @transform_3, window_bounds = array<i64: 128, 128>}, {pipeline_mode = #tpu.pipeline_mode<synchronous>, transform_indices = @transform_4, window_bounds = array<i64: 1, 128>}, {pipeline_mode = #tpu.pipeline_mode<synchronous>, transform_indices = @transform_5, window_bounds = array<i64: 128, 128>}, {pipeline_mode = #tpu.pipeline_mode<synchronous>, transform_indices = @transform_6, window_bounds = array<i64: 1, 128>}, {transform_indices = @transform_7, window_bounds = array<i64: 8, 128>}]} {
    %c0 = arith.constant 0 : index
    %c0_0 = arith.constant 0 : index
    %0 = vector.load %arg1[%c0, %c0_0] : memref<8x1024xf32, #tpu.memory_space<vmem>>, vector<8x1024xf32>
    %c0_1 = arith.constant 0 : index
    %c0_2 = arith.constant 0 : index
    %1 = vector.load %arg3[%c0_1, %c0_2] : memref<1x128xf32, #tpu.memory_space<vmem>>, vector<1x128xf32>
    %c0_3 = arith.constant 0 : index
    %c0_4 = arith.constant 0 : index
    %2 = vector.load %arg2[%c0_3, %c0_4] : memref<1024x128xf32, #tpu.memory_space<vmem>>, vector<1024x128xf32>
    %cst = arith.constant dense<0.000000e+00> : vector<8x128xf32>
    %3 = tpu.matmul %0, %2, %cst {dimension_numbers = #tpu.dot_dimension_numbers<[1], [0], [0], [1], [0, 0, 1, 1], [], []>} : vector<8x1024xf32>, vector<1024x128xf32>, vector<8x128xf32> -> vector<8x128xf32>
    %4 = vector.broadcast %1 : vector<1x128xf32> to vector<8x128xf32>
    %5 = arith.addf %3, %4 : vector<8x128xf32>
    %cst_5 = arith.constant 0.000000e+00 : f32
    %6 = vector.broadcast %cst_5 : f32 to vector<8x128xf32>
    %7 = arith.maximumf %5, %6 : vector<8x128xf32>
    %c0_6 = arith.constant 0 : index
    %c0_7 = arith.constant 0 : index
    %8 = vector.load %arg5[%c0_6, %c0_7] : memref<1x128xf32, #tpu.memory_space<vmem>>, vector<1x128xf32>
    %c0_8 = arith.constant 0 : index
    %c0_9 = arith.constant 0 : index
    %9 = vector.load %arg4[%c0_8, %c0_9] : memref<128x128xf32, #tpu.memory_space<vmem>>, vector<128x128xf32>
    %cst_10 = arith.constant dense<0.000000e+00> : vector<8x128xf32>
    %10 = tpu.matmul %7, %9, %cst_10 {dimension_numbers = #tpu.dot_dimension_numbers<[1], [0], [0], [1], [0, 0, 1, 1], [], []>} : vector<8x128xf32>, vector<128x128xf32>, vector<8x128xf32> -> vector<8x128xf32>
    %11 = vector.broadcast %8 : vector<1x128xf32> to vector<8x128xf32>
    %12 = arith.addf %10, %11 : vector<8x128xf32>
    %cst_11 = arith.constant 0.000000e+00 : f32
    %13 = vector.broadcast %cst_11 : f32 to vector<8x128xf32>
    %14 = arith.maximumf %12, %13 : vector<8x128xf32>
    %c0_12 = arith.constant 0 : index
    %c0_13 = arith.constant 0 : index
    %15 = vector.load %arg7[%c0_12, %c0_13] : memref<1x128xf32, #tpu.memory_space<vmem>>, vector<1x128xf32>
    %c0_14 = arith.constant 0 : index
    %c0_15 = arith.constant 0 : index
    %16 = vector.load %arg6[%c0_14, %c0_15] : memref<128x128xf32, #tpu.memory_space<vmem>>, vector<128x128xf32>
    %cst_16 = arith.constant dense<0.000000e+00> : vector<8x128xf32>
    %17 = tpu.matmul %14, %16, %cst_16 {dimension_numbers = #tpu.dot_dimension_numbers<[1], [0], [0], [1], [0, 0, 1, 1], [], []>} : vector<8x128xf32>, vector<128x128xf32>, vector<8x128xf32> -> vector<8x128xf32>
    %18 = vector.broadcast %15 : vector<1x128xf32> to vector<8x128xf32>
    %19 = arith.addf %17, %18 : vector<8x128xf32>
    %c0_17 = arith.constant 0 : index
    %c0_18 = arith.constant 0 : index
    %20 = vector.load %arg8[%c0_17, %c0_18] : memref<8x128xf32, #tpu.memory_space<vmem>>, vector<8x128xf32>
    tpu.vector_store %arg8[%c0_17, %c0_18], %19 {strides = array<i32>} : memref<8x128xf32, #tpu.memory_space<vmem>>, vector<8x128xf32>,
    return
  }
  func.func @transform_0(%arg0: i32) -> (i32, i32) {
    %c0_i32 = arith.constant 0 : i32
    %c0_i32_0 = arith.constant 0 : i32
    return %arg0, %c0_i32 : i32, i32
  }
  func.func @transform_1(%arg0: i32) -> (i32, i32) {
    %c0_i32 = arith.constant 0 : i32
    %c0_i32_0 = arith.constant 0 : i32
    %c0_i32_1 = arith.constant 0 : i32
    return %c0_i32, %c0_i32_0 : i32, i32
  }
  func.func @transform_2(%arg0: i32) -> (i32, i32) {
    %c0_i32 = arith.constant 0 : i32
    %c0_i32_0 = arith.constant 0 : i32
    %c0_i32_1 = arith.constant 0 : i32
    return %c0_i32, %c0_i32_0 : i32, i32
  }
  func.func @transform_3(%arg0: i32) -> (i32, i32) {
    %c0_i32 = arith.constant 0 : i32
    %c0_i32_0 = arith.constant 0 : i32
    %c0_i32_1 = arith.constant 0 : i32
    return %c0_i32, %c0_i32_0 : i32, i32
  }
  func.func @transform_4(%arg0: i32) -> (i32, i32) {
    %c0_i32 = arith.constant 0 : i32
    %c0_i32_0 = arith.constant 0 : i32
    %c0_i32_1 = arith.constant 0 : i32
    return %c0_i32, %c0_i32_0 : i32, i32
  }
  func.func @transform_5(%arg0: i32) -> (i32, i32) {
    %c0_i32 = arith.constant 0 : i32
    %c0_i32_0 = arith.constant 0 : i32
    %c0_i32_1 = arith.constant 0 : i32
    return %c0_i32, %c0_i32_0 : i32, i32
  }
  func.func @transform_6(%arg0: i32) -> (i32, i32) {
    %c0_i32 = arith.constant 0 : i32
    %c0_i32_0 = arith.constant 0 : i32
    %c0_i32_1 = arith.constant 0 : i32
    return %c0_i32, %c0_i32_0 : i32, i32
  }
  func.func @transform_7(%arg0: i32) -> (i32, i32) {
    %c0_i32 = arith.constant 0 : i32
    %c0_i32_0 = arith.constant 0 : i32
    return %arg0, %c0_i32 : i32, i32
  }
}

</mosaic_0001>

<bundles_post_ra>
// kernel: tpu_custom_call.1
= control target key start
LH: loop header
LB: loop body
LE: loop exit
PB: predicated region body
PF: predicated region fallthrough
CT: control target
= control target key end

     0   :  { %12 = vsyncpa [#allocation3], 0  ;;  %s1404_s0 = inlined_call_operand.hbm [shape: f32[8,1024], index: 0, kind: input, shape index: {}]   ;;  %s1405_s1 = inlined_call_operand.hbm [shape: f32[1024,128], index: 1, kind: input, shape index: {}]   ;;  %s1406_s2 = inlined_call_operand.vmem [shape: f32[1,128], index: 2, kind: input, shape index: {}]   ;;  %s1407_s3 = inlined_call_operand.hbm [shape: f32[128,128], index: 3, kind: input, shape index: {}]   ;;  %s1408_s4 = inlined_call_operand.vmem [shape: f32[1,128], index: 4, kind: input, shape index: {}]   ;;  %s1409_s5 = inlined_call_operand.hbm [shape: f32[128,128], index: 5, kind: input, shape index: {}]   ;;  %s1410_s6 = inlined_call_operand.vmem [shape: f32[1,128], index: 6, kind: input, shape index: {}]   ;;  %s1411_s7 = inlined_call_operand.hbm [shape: f32[8,128], index: 7, kind: output, shape index: {}]  }
   0x1   :  { %13 = vsyncpa [#allocation6], 0 }
   0x2   :  { %14 = vsyncpa [#allocation9], 0 }
   0x3   :  { %15 = vsyncpa [#allocation4], 0  ;;  %s1260_s24 = smov [#allocation5]   ;;  %s1142_s28 = scalar_lea.hbm %s1405_s1, 16384 }
   0x4   :  { %s31_s25 = sshll.u32 %s1260_s24, 4  ;;  %p1143_p0 = scmp.ne.s32.totalorder %s1405_s1, %s1142_s28  ;;  %s32_s25 = int_to_ptr.vmem [resolvable:$true] %s31_s25 }
   0x5   :  { %p1146_p1 = scmp.lt.u32.totalorder %s1142_s28, %s1405_s1 }
   0x7   :  { %p1148_p2 = pnand %p1146_p1, %p1143_p0 }
   0x9   :  { %1151 = shalt.err (!%p1148_p2)
}
   0xa   :  { %s1152_s10 = scalar_lea.vmem %s32_s25, 16384  ;;  %p1157_p4 = scmp.lt.s32.totalorder %s32_s25, %s32_s25 }
   0xb   :  { %p1153_p3 = scmp.ne.s32.totalorder %s32_s25, %s1152_s10  ;;  %p1158_p5 = scmp.lt.s32.totalorder %s1152_s10, %s1152_s10 }
   0xd   :  { %p1159_p6 = por %p1158_p5, %p1157_p4 }
   0xf   :  { %p1160_p7 = pnand %p1159_p6, %p1153_p3 }
  0x11   :  { %1163 = shalt.err (!%p1160_p7)
}
  0x12   :  { %s1261_s11 = smov 128   ;;  %s1262_s12 = smov 8  }
  0x13   :  { %37 = dma.hbm_to_vmem [thread:$0]  %s1405_s1, 16384, %s32_s25, [#allocation6], %s1261_s11, %s1261_s11, %s1262_s12  }
  0x14   :  { %s1263_s15 = smov [#allocation2]   ;;  %s1264_s17 = smov [#allocation7]  }
  0x15   :  { %s22_s16 = sshll.u32 %s1263_s15, 4  ;;  %s45_s18 = sshll.u32 %s1264_s17, 4  ;;  %s23_s16 = int_to_ptr.vmem [resolvable:$true] %s22_s16  ;;  %s46_s18 = int_to_ptr.vmem [resolvable:$true] %s45_s18 }
  0x16   :  { %s1164_s21 = scalar_lea.hbm %s1404_s0, 1024 }
  0x17   :  { %p1165_p8 = scmp.ne.s32.totalorder %s1404_s0, %s1164_s21  ;;  %p1168_p9 = scmp.lt.u32.totalorder %s1164_s21, %s1404_s0 }
  0x19   :  { %p1170_p10 = pnand %p1168_p9, %p1165_p8 }
  0x1b   :  { %1173 = shalt.err (!%p1170_p10)
}
  0x1c   :  { %s1174_s1 = scalar_lea.vmem %s23_s16, 1024  ;;  %p1179_p12 = scmp.lt.s32.totalorder %s23_s16, %s23_s16 }
  0x1d   :  { %p1175_p11 = scmp.ne.s32.totalorder %s23_s16, %s1174_s1  ;;  %p1180_p13 = scmp.lt.s32.totalorder %s1174_s1, %s1174_s1 }
  0x1f   :  { %p1181_p0 = por %p1180_p13, %p1179_p12 }
  0x21   :  { %p1182_p1 = pnand %p1181_p0, %p1175_p11 }
  0x23   :  { %1185 = shalt.err (!%p1182_p1)
}
  0x24   :  { %25 = dma.hbm_to_vmem [thread:$0]  %s1404_s0, 1024, %s23_s16, [#allocation3]  }
  0x25   :  { %s1186_s30 = scalar_lea.hbm %s1407_s3, 2048 }
  0x26   :  { %p1187_p2 = scmp.ne.s32.totalorder %s1407_s3, %s1186_s30  ;;  %p1190_p3 = scmp.lt.u32.totalorder %s1186_s30, %s1407_s3 }
  0x28   :  { %p1192_p4 = pnand %p1190_p3, %p1187_p2 }
  0x2a   :  { %1195 = shalt.err (!%p1192_p4)
}
  0x2b   :  { %s1196_s14 = scalar_lea.vmem %s46_s18, 2048  ;;  %p1201_p6 = scmp.lt.s32.totalorder %s46_s18, %s46_s18 }
  0x2c   :  { %p1197_p5 = scmp.ne.s32.totalorder %s46_s18, %s1196_s14  ;;  %p1202_p7 = scmp.lt.s32.totalorder %s1196_s14, %s1196_s14 }
  0x2e   :  { %p1203_p8 = por %p1202_p7, %p1201_p6 }
  0x30   :  { %p1204_p9 = pnand %p1203_p8, %p1197_p5 }
  0x32   :  { %1207 = shalt.err (!%p1204_p9)
}
  0x33   :  { %51 = dma.hbm_to_vmem [thread:$0]  %s1407_s3, 2048, %s46_s18, [#allocation6], %s1261_s11, %s1261_s11, %s1262_s12  }
  0x34   :  { %s1265_s16 = smov [#allocation8]   ;;  %s1208_s21 = scalar_lea.hbm %s1409_s5, 2048 }
  0x35   :  { %s59_s17 = sshll.u32 %s1265_s16, 4  ;;  %p1209_p10 = scmp.ne.s32.totalorder %s1409_s5, %s1208_s21  ;;  %s60_s17 = int_to_ptr.vmem [resolvable:$true] %s59_s17 }
  0x36   :  { %p1212_p11 = scmp.lt.u32.totalorder %s1208_s21, %s1409_s5 }
  0x38   :  { %p1214_p12 = pnand %p1212_p11, %p1209_p10 }
  0x3a   :  { %1217 = shalt.err (!%p1214_p12)
}
  0x3b   :  { %s1218_s1 = scalar_lea.vmem %s60_s17, 2048  ;;  %p1223_p0 = scmp.lt.s32.totalorder %s60_s17, %s60_s17 }
  0x3c   :  { %p1219_p13 = scmp.ne.s32.totalorder %s60_s17, %s1218_s1  ;;  %p1224_p1 = scmp.lt.s32.totalorder %s1218_s1, %s1218_s1 }
  0x3e   :  { %p1225_p2 = por %p1224_p1, %p1223_p0 }
  0x40   :  { %p1226_p3 = pnand %p1225_p2, %p1219_p13 }
  0x42   :  { %1229 = shalt.err (!%p1226_p3)
}
  0x43   :  { %65 = dma.hbm_to_vmem [thread:$0]  %s1409_s5, 2048, %s60_s17, [#allocation9], %s1261_s11, %s1261_s11, %s1262_s12  }
  0x44   :  { %1252 = dma.done.wait [#allocation3], 1024  }
  0x45   :  { %1253 = vsyncadd [#allocation3], 4294966272 }
  0x46   :  { %1254 = dma.done.wait [#allocation6], 18432  }
  0x47   :  { %1255 = vsyncadd [#allocation6], 4294948864 }
  0x48   :  { %1256 = dma.done.wait [#allocation9], 2048  }
  0x49   :  { %1257 = vsyncadd [#allocation9], 4294965248  ;;  %v105_v0 = vld [vmem:[#allocation5 + $0x80] sm:$0xff]  ;;  %v106_v1 = vld [vmem:[#allocation5 + $0x88] sm:$0xff]  ;;  %vm1267_vm0 = vmmov 0   ;;  %s1269_s28 = smov [#allocation10]  }
  0x4a   :  { %v89_v2 = vld [vmem:[#allocation5] sm:$0xff]  ;;  %v956_v3 = vpack.c.bf16 %v106_v1, %v105_v0  ;;  %v90_v4 = vld [vmem:[#allocation5 + $0x8] sm:$0xff]  ;;  %v107_v11 = vld [vmem:[#allocation5 + $0x90] sm:$0xff]  ;;  %s698_s29 = sshll.u32 %s1269_s28, 4  ;;  %s699_s29 = int_to_ptr.vmem [resolvable:$true] %s698_s29 }
  0x4b   :  { %v137_v5 = vld [vmem:[#allocation5 + $0x180] sm:$0xff]  ;;  %v138_v6 = vld [vmem:[#allocation5 + $0x188] sm:$0xff]  ;;  %v958_v7 = vpack.c.bf16 %v90_v4, %v89_v2  ;;  %v108_v13 = vld [vmem:[#allocation5 + $0x98] sm:$0xff]  ;;  %s1230_s30 = scalar_lea.vmem %s699_s29, 128  ;;  %p1235_p5 = scmp.lt.s32.totalorder %s699_s29, %s699_s29 }
  0x4c   :  { %v988_v8 = vpack.c.bf16 %v138_v6, %v137_v5  ;;  %v121_v9 = vld [vmem:[#allocation5 + $0x100] sm:$0xff]  ;;  %v122_v10 = vld [vmem:[#allocation5 + $0x108] sm:$0xff]  ;;  %957 = vmatprep.subr.bf16.mxu0 %v956_v3  ;;  %v91_v14 = vld [vmem:[#allocation5 + $0x10] sm:$0xff]  ;;  %v960_v16 = vpack.c.bf16 %v108_v13, %v107_v11  ;;  %p1231_p4 = scmp.ne.s32.totalorder %s699_s29, %s1230_s30  ;;  %p1236_p6 = scmp.lt.s32.totalorder %s1230_s30, %s1230_s30 }
  0x4d   :  { %v990_v12 = vpack.c.bf16 %v122_v10, %v121_v9  ;;  %v92_v15 = vld [vmem:[#allocation5 + $0x18] sm:$0xff]  ;;  %959 = vmatpush3.bf16.msra.mxu0 %v958_v7  ;;  %v139_v18 = vld [vmem:[#allocation5 + $0x190] sm:$0xff]  ;;  %v109_v23 = vld [vmem:[#allocation5 + $0xa0] sm:$0xff] }
  0x4e   :  { %989 = vmatprep.subr.bf16.mxu1 %v988_v8  ;;  %v962_v17 = vpack.c.bf16 %v92_v15, %v91_v14  ;;  %v140_v19 = vld [vmem:[#allocation5 + $0x198] sm:$0xff]  ;;  %v123_v20 = vld [vmem:[#allocation5 + $0x110] sm:$0xff]  ;;  %v110_v24 = vld [vmem:[#allocation5 + $0xa8] sm:$0xff]  ;;  %961 = vmatprep.subr.bf16.mxu0 %v960_v16  ;;  %p1237_p7 = por %p1236_p6, %p1235_p5 }
  0x4f   :  { %991 = vmatpush3.bf16.msra.mxu1 %v990_v12  ;;  %v992_v21 = vpack.c.bf16 %v140_v19, %v139_v18  ;;  %v124_v22 = vld [vmem:[#allocation5 + $0x118] sm:$0xff]  ;;  %v964_v26 = vpack.c.bf16 %v110_v24, %v109_v23  ;;  %v93_v27 = vld [vmem:[#allocation5 + $0x20] sm:$0xff]  ;;  %v94_v28 = vld [vmem:[#allocation5 + $0x28] sm:$0xff] }
  0x50   :  { %v994_v25 = vpack.c.bf16 %v124_v22, %v123_v20  ;;  %v141_v29 = vld [vmem:[#allocation5 + $0x1a0] sm:$0xff]  ;;  %v142_v30 = vld [vmem:[#allocation5 + $0x1a8] sm:$0xff]  ;;  %v966_v33 = vpack.c.bf16 %v94_v28, %v93_v27  ;;  %v111_v35 = vld [vmem:[#allocation5 + $0xb0] sm:$0xff]  ;;  %p1238_p8 = pnand %p1237_p7, %p1231_p4 }
  0x51   :  { %993 = vmatprep.subr.bf16.mxu1 %v992_v21  ;;  %v125_v31 = vld [vmem:[#allocation5 + $0x120] sm:$0xff]  ;;  %v126_v32 = vld [vmem:[#allocation5 + $0x128] sm:$0xff]  ;;  %963 = vmatpush3.bf16.msra.mxu0 %v962_v17  ;;  %v996_v34 = vpack.c.bf16 %v142_v30, %v141_v29  ;;  %v112_v36 = vld [vmem:[#allocation5 + $0xb8] sm:$0xff] }
  0x52   :  { %v95_v37 = vld [vmem:[#allocation5 + $0x30] sm:$0xff]  ;;  %965 = vmatprep.subr.bf16.mxu0 %v964_v26  ;;  %v998_v38 = vpack.c.bf16 %v126_v32, %v125_v31  ;;  %v968_v39 = vpack.c.bf16 %v112_v36, %v111_v35  ;;  %v96_v40 = vld [vmem:[#allocation5 + $0x38] sm:$0xff]  ;;  %v113_v46 = vld [vmem:[#allocation5 + $0xc0] sm:$0xff] }
  0x53   :  { %995 = vmatpush3.bf16.msra.mxu1 %v994_v25  ;;  %v143_v41 = vld [vmem:[#allocation5 + $0x1b0] sm:$0xff]  ;;  %v144_v42 = vld [vmem:[#allocation5 + $0x1b8] sm:$0xff]  ;;  %v114_v47 = vld [vmem:[#allocation5 + $0xc8] sm:$0xff]  ;;  %v970_v48 = vpack.c.bf16 %v96_v40, %v95_v37 }
  0x54   :  { %997 = vmatprep.subr.bf16.mxu1 %v996_v34  ;;  %v1000_v43 = vpack.c.bf16 %v144_v42, %v143_v41  ;;  %v127_v44 = vld [vmem:[#allocation5 + $0x130] sm:$0xff]  ;;  %v128_v45 = vld [vmem:[#allocation5 + $0x138] sm:$0xff]  ;;  %v145_v49 = vld [vmem:[#allocation5 + $0x1c0] sm:$0xff]  ;;  %v972_v52 = vpack.c.bf16 %v114_v47, %v113_v46 }
  0x55   :  { %967 = vmatpush3.bf16.msra.mxu0 %v966_v33  ;;  %v146_v50 = vld [vmem:[#allocation5 + $0x1c8] sm:$0xff]  ;;  %v1002_v51 = vpack.c.bf16 %v128_v45, %v127_v44  ;;  %v97_v53 = vld [vmem:[#allocation5 + $0x40] sm:$0xff]  ;;  %v115_v58 = vld [vmem:[#allocation5 + $0xd0] sm:$0xff] }
  0x56   :  { %969 = vmatprep.subr.bf16.mxu0 %v968_v39  ;;  %v98_v54 = vld [vmem:[#allocation5 + $0x48] sm:$0xff]  ;;  %v129_v55 = vld [vmem:[#allocation5 + $0x140] sm:$0xff]  ;;  %v1004_v56 = vpack.c.bf16 %v146_v50, %v145_v49  ;;  %v116_v59 = vld [vmem:[#allocation5 + $0xd8] sm:$0xff] }
  0x57   :  { %999 = vmatpush3.bf16.msra.mxu1 %v998_v38  ;;  %v130_v57 = vld [vmem:[#allocation5 + $0x148] sm:$0xff]  ;;  %v147_v60 = vld [vmem:[#allocation5 + $0x1d0] sm:$0xff]  ;;  %v148_v61 = vld [vmem:[#allocation5 + $0x1d8] sm:$0xff]  ;;  %v974_v62 = vpack.c.bf16 %v98_v54, %v97_v53  ;;  %v976_v0 = vpack.c.bf16 %v116_v59, %v115_v58 }
  0x58   :  { %1001 = vmatprep.subr.bf16.mxu1 %v1000_v43  ;;  %v1006_v63 = vpack.c.bf16 %v130_v57, %v129_v55  ;;  %v99_v1 = vld [vmem:[#allocation5 + $0x50] sm:$0xff]  ;;  %v100_v2 = vld [vmem:[#allocation5 + $0x58] sm:$0xff]  ;;  %v1008_v4 = vpack.c.bf16 %v148_v61, %v147_v60  ;;  %v117_v6 = vld [vmem:[#allocation5 + $0xe0] sm:$0xff] }
  0x59   :  { %971 = vmatpush3.bf16.msra.mxu0 %v970_v48  ;;  %v131_v3 = vld [vmem:[#allocation5 + $0x150] sm:$0xff]  ;;  %v132_v5 = vld [vmem:[#allocation5 + $0x158] sm:$0xff]  ;;  %v118_v7 = vld [vmem:[#allocation5 + $0xe8] sm:$0xff]  ;;  %v978_v10 = vpack.c.bf16 %v100_v2, %v99_v1 }
  0x5a   :  { %973 = vmatprep.subr.bf16.mxu0 %v972_v52  ;;  %v149_v8 = vld [vmem:[#allocation5 + $0x1e0] sm:$0xff]  ;;  %v150_v9 = vld [vmem:[#allocation5 + $0x1e8] sm:$0xff]  ;;  %v1010_v13 = vpack.c.bf16 %v132_v5, %v131_v3  ;;  %v980_v14 = vpack.c.bf16 %v118_v7, %v117_v6  ;;  %v119_v19 = vld [vmem:[#allocation5 + $0xf0] sm:$0xff] }
  0x5b   :  { %1003 = vmatpush3.bf16.msra.mxu1 %v1002_v51  ;;  %v101_v11 = vld [vmem:[#allocation5 + $0x60] sm:$0xff]  ;;  %v102_v12 = vld [vmem:[#allocation5 + $0x68] sm:$0xff]  ;;  %v1012_v18 = vpack.c.bf16 %v150_v9, %v149_v8  ;;  %v120_v20 = vld [vmem:[#allocation5 + $0xf8] sm:$0xff] }
  0x5c   :  { %1005 = vmatprep.subr.bf16.mxu1 %v1004_v56  ;;  %v133_v15 = vld [vmem:[#allocation5 + $0x160] sm:$0xff]  ;;  %v134_v16 = vld [vmem:[#allocation5 + $0x168] sm:$0xff]  ;;  %v83_v21 = vld [vmem:[#allocation2 + $0x18] sm:$0xff]  ;;  %v982_v24 = vpack.c.bf16 %v102_v12, %v101_v11  ;;  %v984_v26 = vpack.c.bf16 %v120_v20, %v119_v19 }
  0x5d   :  { %975 = vmatpush3.bf16.msra.mxu0 %v974_v62  ;;  %v81_v17 = vld [vmem:[#allocation2 + $0x8] sm:$0xff]  ;;  %v151_v22 = vld [vmem:[#allocation5 + $0x1f0] sm:$0xff]  ;;  %v152_v23 = vld [vmem:[#allocation5 + $0x1f8] sm:$0xff]  ;;  %357 = vmatprep.mubr.f32.mxu1 %v83_v21  ;;  %v1014_v25 = vpack.c.bf16 %v134_v16, %v133_v15 }
  0x5e   :  { %977 = vmatprep.subr.bf16.mxu0 %v976_v0  ;;  %287 = vmatprep.mubr.f32.mxu0 %v81_v17  ;;  %v103_v27 = vld [vmem:[#allocation5 + $0x70] sm:$0xff]  ;;  %v104_v28 = vld [vmem:[#allocation5 + $0x78] sm:$0xff]  ;;  %v1016_v30 = vpack.c.bf16 %v152_v23, %v151_v22  ;;  %v169_v32 = vld [vmem:[#allocation5 + $0x280] sm:$0xff] }
  0x5f   :  { %1007 = vmatpush3.bf16.msra.mxu1 %v1006_v63  ;;  %v135_v29 = vld [vmem:[#allocation5 + $0x170] sm:$0xff]  ;;  %v136_v31 = vld [vmem:[#allocation5 + $0x178] sm:$0xff]  ;;  %v170_v33 = vld [vmem:[#allocation5 + $0x288] sm:$0xff]  ;;  %v986_v36 = vpack.c.bf16 %v104_v28, %v103_v27 }
  0x60   :  { %1009 = vmatprep.subr.bf16.mxu1 %v1008_v4  ;;  %v201_v34 = vld [vmem:[#allocation5 + $0x380] sm:$0xff]  ;;  %v202_v35 = vld [vmem:[#allocation5 + $0x388] sm:$0xff]  ;;  %v1018_v37 = vpack.c.bf16 %v136_v31, %v135_v29  ;;  %v1020_v38 = vpack.c.bf16 %v170_v33, %v169_v32  ;;  %v171_v44 = vld [vmem:[#allocation5 + $0x290] sm:$0xff] }
  0x61   :  { %979 = vmatpush3.bf16.msra.mxu0 %v978_v10  ;;  %v153_v39 = vld [vmem:[#allocation5 + $0x200] sm:$0xff]  ;;  %v154_v40 = vld [vmem:[#allocation5 + $0x208] sm:$0xff]  ;;  %v1052_v42 = vpack.c.bf16 %v202_v35, %v201_v34  ;;  %v172_v45 = vld [vmem:[#allocation5 + $0x298] sm:$0xff] }
  0x62   :  { %981 = vmatprep.subr.bf16.mxu0 %v980_v14  ;;  %v185_v41 = vld [vmem:[#allocation5 + $0x300] sm:$0xff]  ;;  %v186_v43 = vld [vmem:[#allocation5 + $0x308] sm:$0xff]  ;;  %v203_v46 = vld [vmem:[#allocation5 + $0x390] sm:$0xff]  ;;  %v1022_v49 = vpack.c.bf16 %v154_v40, %v153_v39  ;;  %v1024_v52 = vpack.c.bf16 %v172_v45, %v171_v44 }
  0x63   :  { %1011 = vmatpush3.bf16.msra.mxu1 %v1010_v13  ;;  %v204_v47 = vld [vmem:[#allocation5 + $0x398] sm:$0xff]  ;;  %v80_v48 = vld [vmem:[#allocation2] sm:$0xff]  ;;  %v82_v50 = vld [vmem:[#allocation2 + $0x10] sm:$0xff]  ;;  %v1054_v51 = vpack.c.bf16 %v186_v43, %v185_v41 }
  0x64   :  { %1013 = vmatprep.subr.bf16.mxu1 %v1012_v18  ;;  %v155_v53 = vld [vmem:[#allocation5 + $0x210] sm:$0xff]  ;;  %v156_v54 = vld [vmem:[#allocation5 + $0x218] sm:$0xff]  ;;  %v1056_v56 = vpack.c.bf16 %v204_v47, %v203_v46  ;;  %v173_v58 = vld [vmem:[#allocation5 + $0x2a0] sm:$0xff] }
  0x65   :  { %983 = vmatpush3.bf16.msra.mxu0 %v982_v24  ;;  %v187_v55 = vld [vmem:[#allocation5 + $0x310] sm:$0xff]  ;;  %v188_v57 = vld [vmem:[#allocation5 + $0x318] sm:$0xff]  ;;  %v174_v59 = vld [vmem:[#allocation5 + $0x2a8] sm:$0xff]  ;;  %v1026_v62 = vpack.c.bf16 %v156_v54, %v155_v53 }
  0x66   :  { %985 = vmatprep.subr.bf16.mxu0 %v984_v26  ;;  %v205_v60 = vld [vmem:[#allocation5 + $0x3a0] sm:$0xff]  ;;  %v206_v61 = vld [vmem:[#allocation5 + $0x3a8] sm:$0xff]  ;;  %v1058_v63 = vpack.c.bf16 %v188_v57, %v187_v55  ;;  %v1028_v0 = vpack.c.bf16 %v174_v59, %v173_v58  ;;  %v175_v6 = vld [vmem:[#allocation5 + $0x2b0] sm:$0xff] }
  0x67   :  { %1015 = vmatpush3.bf16.msra.mxu1 %v1014_v25  ;;  %v157_v1 = vld [vmem:[#allocation5 + $0x220] sm:$0xff]  ;;  %v158_v2 = vld [vmem:[#allocation5 + $0x228] sm:$0xff]  ;;  %v1060_v4 = vpack.c.bf16 %v206_v61, %v205_v60  ;;  %v176_v7 = vld [vmem:[#allocation5 + $0x2b8] sm:$0xff] }
  0x68   :  { %1017 = vmatprep.subr.bf16.mxu1 %v1016_v30  ;;  %v189_v3 = vld [vmem:[#allocation5 + $0x320] sm:$0xff]  ;;  %v190_v5 = vld [vmem:[#allocation5 + $0x328] sm:$0xff]  ;;  %v207_v8 = vld [vmem:[#allocation5 + $0x3b0] sm:$0xff]  ;;  %v1030_v10 = vpack.c.bf16 %v158_v2, %v157_v1  ;;  %v1032_v12 = vpack.c.bf16 %v176_v7, %v175_v6 }
  0x69   :  { %987 = vmatpush3.bf16.msra.mxu0 %v986_v36  ;;  %v208_v9 = vld [vmem:[#allocation5 + $0x3b8] sm:$0xff]  ;;  %v1062_v11 = vpack.c.bf16 %v190_v5, %v189_v3  ;;  %v159_v13 = vld [vmem:[#allocation5 + $0x230] sm:$0xff]  ;;  %v177_v18 = vld [vmem:[#allocation5 + $0x2c0] sm:$0xff] }
  0x6a   :  { %1021 = vmatprep.subr.bf16.mxu0 %v1020_v38  ;;  %v160_v14 = vld [vmem:[#allocation5 + $0x238] sm:$0xff]  ;;  %v191_v15 = vld [vmem:[#allocation5 + $0x330] sm:$0xff]  ;;  %v1064_v16 = vpack.c.bf16 %v208_v9, %v207_v8  ;;  %v178_v19 = vld [vmem:[#allocation5 + $0x2c8] sm:$0xff] }
  0x6b   :  { %1019 = vmatpush3.bf16.msra.mxu1 %v1018_v37  ;;  %v192_v17 = vld [vmem:[#allocation5 + $0x338] sm:$0xff]  ;;  %v209_v20 = vld [vmem:[#allocation5 + $0x3c0] sm:$0xff]  ;;  %v210_v21 = vld [vmem:[#allocation5 + $0x3c8] sm:$0xff]  ;;  %v1034_v22 = vpack.c.bf16 %v160_v14, %v159_v13  ;;  %v1036_v26 = vpack.c.bf16 %v178_v19, %v177_v18 }
  0x6c   :  { %1053 = vmatprep.subr.bf16.mxu1 %v1052_v42  ;;  %288 = vmatmul.mubr.f32.vlgmr.msra.gmra.mrb[0].mxu0 %v80_v48  ;;  %v85_v23 = vld [vmem:[#allocation2 + $0x28] sm:$0xff]  ;;  %v87_v24 = vld [vmem:[#allocation2 + $0x38] sm:$0xff]  ;;  %v1066_v25 = vpack.c.bf16 %v192_v17, %v191_v15  ;;  %v161_v27 = vld [vmem:[#allocation5 + $0x240] sm:$0xff]  ;;  %v1068_v30 = vpack.c.bf16 %v210_v21, %v209_v20 }
  0x6d   :  { %1023 = vmatpush3.bf16.msra.mxu0 %v1022_v49  ;;  %v162_v28 = vld [vmem:[#allocation5 + $0x248] sm:$0xff]  ;;  %v193_v29 = vld [vmem:[#allocation5 + $0x340] sm:$0xff]  ;;  %v179_v32 = vld [vmem:[#allocation5 + $0x2d0] sm:$0xff]  ;;  %427 = vmatprep.mubr.f32.mxu0 %v85_v23 }
  0x6e   :  { %358 = vmatmul.mubr.f32.vlgmr.msra.gmra.mrb[0].mxu1 %v82_v50  ;;  %1025 = vmatprep.subr.bf16.mxu0 %v1024_v52  ;;  %v194_v31 = vld [vmem:[#allocation5 + $0x348] sm:$0xff]  ;;  %v180_v33 = vld [vmem:[#allocation5 + $0x2d8] sm:$0xff]  ;;  %v211_v34 = vld [vmem:[#allocation5 + $0x3d0] sm:$0xff]  ;;  %v1038_v36 = vpack.c.bf16 %v162_v28, %v161_v27 }
  0x6f   :  { %1055 = vmatpush3.bf16.msra.mxu1 %v1054_v51  ;;  %v212_v35 = vld [vmem:[#allocation5 + $0x3d8] sm:$0xff]  ;;  %497 = vmatprep.mubr.f32.mxu1 %v87_v24  ;;  %v1070_v37 = vpack.c.bf16 %v194_v31, %v193_v29  ;;  %v1040_v38 = vpack.c.bf16 %v180_v33, %v179_v32  ;;  %v163_v39 = vld [vmem:[#allocation5 + $0x250] sm:$0xff]  ;;  %v181_v44 = vld [vmem:[#allocation5 + $0x2e0] sm:$0xff]  ;;  %v1268_v33 = vmov 0.0  }
  0x70   :  { %1057 = vmatprep.subr.bf16.mxu1 %v1056_v56  ;;  %v164_v40 = vld [vmem:[#allocation5 + $0x258] sm:$0xff]  ;;  %v195_v41 = vld [vmem:[#allocation5 + $0x350] sm:$0xff]  ;;  %v1072_v42 = vpack.c.bf16 %v212_v35, %v211_v34  ;;  %v182_v45 = vld [vmem:[#allocation5 + $0x2e8] sm:$0xff] }
  0x71   :  { %1027 = vmatpush3.bf16.msra.mxu0 %v1026_v62  ;;  %v196_v43 = vld [vmem:[#allocation5 + $0x358] sm:$0xff]  ;;  %v213_v46 = vld [vmem:[#allocation5 + $0x3e0] sm:$0xff]  ;;  %v214_v47 = vld [vmem:[#allocation5 + $0x3e8] sm:$0xff]  ;;  %v1042_v48 = vpack.c.bf16 %v164_v40, %v163_v39  ;;  %v1044_v50 = vpack.c.bf16 %v182_v45, %v181_v44 }
  0x72   :  { %1029 = vmatprep.subr.bf16.mxu0 %v1028_v0  ;;  %v1074_v49 = vpack.c.bf16 %v196_v43, %v195_v41  ;;  %v165_v51 = vld [vmem:[#allocation5 + $0x260] sm:$0xff]  ;;  %v166_v52 = vld [vmem:[#allocation5 + $0x268] sm:$0xff]  ;;  %v1076_v54 = vpack.c.bf16 %v214_v47, %v213_v46  ;;  %v183_v56 = vld [vmem:[#allocation5 + $0x2f0] sm:$0xff] }
  0x73   :  { %1059 = vmatpush3.bf16.msra.mxu1 %v1058_v63  ;;  %v197_v53 = vld [vmem:[#allocation5 + $0x360] sm:$0xff]  ;;  %v198_v55 = vld [vmem:[#allocation5 + $0x368] sm:$0xff]  ;;  %v184_v57 = vld [vmem:[#allocation5 + $0x2f8] sm:$0xff]  ;;  %v1046_v60 = vpack.c.bf16 %v166_v52, %v165_v51 }
  0x74   :  { %1061 = vmatprep.subr.bf16.mxu1 %v1060_v4  ;;  %v215_v58 = vld [vmem:[#allocation5 + $0x3f0] sm:$0xff]  ;;  %v216_v59 = vld [vmem:[#allocation5 + $0x3f8] sm:$0xff]  ;;  %v1078_v61 = vpack.c.bf16 %v198_v55, %v197_v53  ;;  %v1048_v62 = vpack.c.bf16 %v184_v57, %v183_v56  ;;  %v84_v6 = vld [vmem:[#allocation2 + $0x20] sm:$0xff] }
  0x75   :  { %1031 = vmatpush3.bf16.msra.mxu0 %v1030_v10  ;;  %v167_v63 = vld [vmem:[#allocation5 + $0x270] sm:$0xff]  ;;  %v168_v0 = vld [vmem:[#allocation5 + $0x278] sm:$0xff]  ;;  %v1080_v1 = vpack.c.bf16 %v216_v59, %v215_v58  ;;  %v505_v8 = vld [vmem:[#allocation7] sm:$0xff] }
  0x76   :  { %1033 = vmatprep.subr.bf16.mxu0 %v1032_v12  ;;  %v199_v2 = vld [vmem:[#allocation5 + $0x370] sm:$0xff]  ;;  %v200_v3 = vld [vmem:[#allocation5 + $0x378] sm:$0xff]  ;;  %v1050_v4 = vpack.c.bf16 %v168_v0, %v167_v63  ;;  %v506_v9 = vld [vmem:[#allocation7 + $0x8] sm:$0xff] }
  0x77   :  { %1063 = vmatpush3.bf16.msra.mxu1 %v1062_v11  ;;  %v1082_v5 = vpack.c.bf16 %v200_v3, %v199_v2  ;;  %v86_v7 = vld [vmem:[#allocation2 + $0x30] sm:$0xff]  ;;  %v1266_v11 = vmov 0.0|0.0   ;;  %v1085_v12 = vpack.c.bf16 %v506_v9, %v505_v8  ;;  %v508_v13 = vld [vmem:[#allocation7 + $0x18] sm:$0xff]  ;;  %v509_v15 = vld [vmem:[#allocation7 + $0x20] sm:$0xff] }
  0x78   :  { %1065 = vmatprep.subr.bf16.mxu1 %v1064_v16  ;;  %v507_v10 = vld [vmem:[#allocation7 + $0x10] sm:$0xff]  ;;  %v510_v16 = vld [vmem:[#allocation7 + $0x28] sm:$0xff]  ;;  %v512_v19 = vld [vmem:[#allocation7 + $0x38] sm:$0xff] }
  0x79   :  { %1035 = vmatpush3.bf16.msra.mxu0 %v1034_v22  ;;  %v1088_v14 = vpack.c.bf16 %v508_v13, %v507_v10  ;;  %v1091_v17 = vpack.c.bf16 %v510_v16, %v509_v15  ;;  %v511_v18 = vld [vmem:[#allocation7 + $0x30] sm:$0xff]  ;;  %v513_v21 = vld [vmem:[#allocation7 + $0x40] sm:$0xff]  ;;  %v514_v22 = vld [vmem:[#allocation7 + $0x48] sm:$0xff] }
  0x7a   :  { %1037 = vmatprep.subr.bf16.mxu0 %v1036_v26  ;;  %v1094_v20 = vpack.c.bf16 %v512_v19, %v511_v18  ;;  %v1097_v23 = vpack.c.bf16 %v514_v22, %v513_v21  ;;  %v515_v24 = vld [vmem:[#allocation7 + $0x50] sm:$0xff]  ;;  %v517_v27 = vld [vmem:[#allocation7 + $0x60] sm:$0xff]  ;;  %v518_v28 = vld [vmem:[#allocation7 + $0x68] sm:$0xff] }
  0x7b   :  { %1067 = vmatpush3.bf16.msra.mxu1 %v1066_v25  ;;  %v516_v25 = vld [vmem:[#allocation7 + $0x58] sm:$0xff]  ;;  %v1103_v29 = vpack.c.bf16 %v518_v28, %v517_v27  ;;  %v599_v34 = vld [vmem:[#allocation8] sm:$0xff]  ;;  %v600_v35 = vld [vmem:[#allocation8 + $0x8] sm:$0xff] }
  0x7c   :  { %1069 = vmatprep.subr.bf16.mxu1 %v1068_v30  ;;  %v1100_v26 = vpack.c.bf16 %v516_v25, %v515_v24  ;;  %v519_v30 = vld [vmem:[#allocation7 + $0x70] sm:$0xff]  ;;  %v520_v31 = vld [vmem:[#allocation7 + $0x78] sm:$0xff]  ;;  %v603_v40 = vld [vmem:[#allocation8 + $0x20] sm:$0xff] }
  0x7d   :  { %1039 = vmatpush3.bf16.msra.mxu0 %v1038_v36  ;;  %v1106_v32 = vpack.c.bf16 %v520_v31, %v519_v30  ;;  %v601_v36 = vld [vmem:[#allocation8 + $0x10] sm:$0xff]  ;;  %v604_v41 = vld [vmem:[#allocation8 + $0x28] sm:$0xff]  ;;  %v606_v44 = vld [vmem:[#allocation8 + $0x38] sm:$0xff] }
  0x7e   :  { %1041 = vmatprep.subr.bf16.mxu0 %v1040_v38  ;;  %v602_v38 = vld [vmem:[#allocation8 + $0x18] sm:$0xff]  ;;  %v605_v43 = vld [vmem:[#allocation8 + $0x30] sm:$0xff]  ;;  %v607_v46 = vld [vmem:[#allocation8 + $0x40] sm:$0xff] }
  0x7f   :  { %1071 = vmatpush3.bf16.msra.mxu1 %v1070_v37  ;;  %v1109_v37 = vpack.c.bf16 %v600_v35, %v599_v34  ;;  %v1112_v39 = vpack.c.bf16 %v602_v38, %v601_v36  ;;  %v1118_v45 = vpack.c.bf16 %v606_v44, %v605_v43  ;;  %v608_v47 = vld [vmem:[#allocation8 + $0x48] sm:$0xff]  ;;  %v611_v52 = vld [vmem:[#allocation8 + $0x60] sm:$0xff]  ;;  %v613_v9 = vld [vmem:[#allocation8 + $0x70] sm:$0xff] }
  0x80   :  { %1073 = vmatprep.subr.bf16.mxu1 %v1072_v42  ;;  %v1115_v42 = vpack.c.bf16 %v604_v41, %v603_v40  ;;  %v612_v53 = vld [vmem:[#allocation8 + $0x68] sm:$0xff]  ;;  %v709_v56 = vld [vmem:[%s1406_s2] ss:$0 sm:$0xff]  ;;  %v614_v10 = vld [vmem:[#allocation8 + $0x78] sm:$0xff] }
  0x81   :  { %1043 = vmatpush3.bf16.msra.mxu0 %v1042_v48  ;;  %v1121_v48 = vpack.c.bf16 %v608_v47, %v607_v46 }
  0x82   :  { %1045 = vmatprep.subr.bf16.mxu0 %v1044_v50  ;;  %v610_v50 = vld [vmem:[#allocation8 + $0x58] sm:$0xff] }
  0x83   :  { %1075 = vmatpush3.bf16.msra.mxu1 %v1074_v49  ;;  %v609_v49 = vld [vmem:[#allocation8 + $0x50] sm:$0xff] }
  0x84   :  { %1077 = vmatprep.subr.bf16.mxu1 %v1076_v54  ;;  %v1124_v51 = vpack.c.bf16 %v610_v50, %v609_v49  ;;  %v1127_v54 = vpack.c.bf16 %v612_v53, %v611_v52 }
  0x85   :  { %1047 = vmatpush3.bf16.msra.mxu0 %v1046_v60 }
  0x86   :  { %1049 = vmatprep.subr.bf16.mxu0 %v1048_v62 }
  0x87   :  { %1079 = vmatpush3.bf16.msra.mxu1 %v1078_v61 }
  0x88   :  { %1081 = vmatprep.subr.bf16.mxu1 %v1080_v1 }
  0x89   :  { %1051 = vmatpush3.bf16.msra.mxu0 %v1050_v4 }
  0x8a   :  { %1084 = vmatprep.subr.bf16.mxu0 %v1266_v11 }
  0x8b   :  { %1083 = vmatpush3.bf16.msra.mxu1 %v1082_v5 }
  0x8c   :  { %428 = vmatmul.mubr.f32.vlgmr.msra.gmra.mrb[2].mxu0 %v84_v6  ;;  %1108 = vmatprep.subr.bf16.mxu1 %v1266_v11 }
  0x8d   :  { %1086 = vmatpush3.bf16.msra.mxu0 %v1085_v12  ;;  %918 = vmatprep.mubr.msk.f32.mxu0 %vm1267_vm0, %v1268_v33  ;;  %v710_v12 = vld [vmem:[%s1408_s4] ss:$0 sm:$0xff] }
  0x8e   :  { %498 = vmatmul.mubr.f32.vlgmr.msra.gmra.mrb[2].mxu1 %v86_v7  ;;  %1087 = vmatprep.subr.bf16.mxu0 %v1266_v11 }
  0x8f   :  { %953 = vmatprep.mubr.msk.f32.mxu1 %vm1267_vm0, %v1268_v33  ;;  %1110 = vmatpush3.bf16.msra.mxu1 %v1109_v37 }
  0x90   :  { %1111 = vmatprep.subr.bf16.mxu1 %v1266_v11 }
  0x91   :  { %1089 = vmatpush3.bf16.msra.mxu0 %v1088_v14 }
  0x92   :  { %1090 = vmatprep.subr.bf16.mxu0 %v1266_v11 }
  0x93   :  { %1113 = vmatpush3.bf16.msra.mxu1 %v1112_v39 }
  0x94   :  { %1114 = vmatprep.subr.bf16.mxu1 %v1266_v11 }
  0x95   :  { %1092 = vmatpush3.bf16.msra.mxu0 %v1091_v17  ;;  %v711_v17 = vld [vmem:[%s1410_s6] ss:$0 sm:$0xff] }
  0x96   :  { %1093 = vmatprep.subr.bf16.mxu0 %v1266_v11 }
  0x97   :  { %1116 = vmatpush3.bf16.msra.mxu1 %v1115_v42 }
  0x98   :  { %1117 = vmatprep.subr.bf16.mxu1 %v1266_v11 }
  0x99   :  { %1095 = vmatpush3.bf16.msra.mxu0 %v1094_v20 }
  0x9a   :  { %1096 = vmatprep.subr.bf16.mxu0 %v1266_v11 }
  0x9b   :  { %1119 = vmatpush3.bf16.msra.mxu1 %v1118_v45 }
  0x9c   :  { %1120 = vmatprep.subr.bf16.mxu1 %v1266_v11 }
  0x9d   :  { %1098 = vmatpush3.bf16.msra.mxu0 %v1097_v23 }
  0x9e   :  { %1099 = vmatprep.subr.bf16.mxu0 %v1266_v11 }
  0x9f   :  { %1122 = vmatpush3.bf16.msra.mxu1 %v1121_v48 }
  0xa0   :  { %1123 = vmatprep.subr.bf16.mxu1 %v1266_v11 }
  0xa1   :  { %1101 = vmatpush3.bf16.msra.mxu0 %v1100_v26 }
  0xa2   :  { %1102 = vmatprep.subr.bf16.mxu0 %v1266_v11 }
  0xa3   :  { %1125 = vmatpush3.bf16.msra.mxu1 %v1124_v51 }
  0xa4   :  { %1126 = vmatprep.subr.bf16.mxu1 %v1266_v11 }
  0xa5   :  { %1104 = vmatpush3.bf16.msra.mxu0 %v1103_v29 }
  0xa6   :  { %1105 = vmatprep.subr.bf16.mxu0 %v1266_v11 }
  0xa7   :  { %1128 = vmatpush3.bf16.msra.mxu1 %v1127_v54 }
  0xa8   :  { %1129 = vmatprep.subr.bf16.mxu1 %v1266_v11  ;;  %v1130_v11 = vpack.c.bf16 %v614_v10, %v613_v9 }
  0xa9   :  { %1107 = vmatpush3.bf16.msra.mxu0 %v1106_v32 }
  0xab   :  { %1131 = vmatpush3.bf16.msra.mxu1 %v1130_v11 }
 0x13f   :  { %v744_v55 = vpop.f32.mrb[0].mxu0 }
 0x140   :  { %v745_v57 = vpop.f32.mrb[1].mxu0 }
 0x141   :  { %v779_v58 = vpop.f32.mrb[0].mxu1  ;;  %v746_v59 = vadd.f32 %v745_v57, %v744_v55 }
 0x142   :  { %v780_v60 = vpop.f32.mrb[1].mxu1 }
 0x143   :  { %v781_v61 = vadd.f32 %v780_v60, %v779_v58  ;;  %v290_v62 = vadd.f32 %v746_v59, %v709_v56 }
 0x145   :  { %v360_v63 = vadd.f32 %v781_v61, %v290_v62 }
 0x15f   :  { %v814_v0 = vpop.f32.mrb[2].mxu0 }
 0x160   :  { %v815_v1 = vpop.f32.mrb[3].mxu0 }
 0x161   :  { %v849_v2 = vpop.f32.mrb[2].mxu1  ;;  %v816_v3 = vadd.f32 %v815_v1, %v814_v0 }
 0x162   :  { %v850_v4 = vpop.f32.mrb[3].mxu1 }
 0x163   :  { %v851_v5 = vadd.f32 %v850_v4, %v849_v2  ;;  %v430_v6 = vadd.f32 %v816_v3, %v360_v63 }
 0x165   :  { %v500_v7 = vadd.f32 %v851_v5, %v430_v6 }
 0x167   :  { %v503_v8 = vmax.f32 %v500_v7, 0.0 }
 0x169   :  { %919 = vmatmul.mubr.f32.vlgmr.msra.gmra.mrb[4].mxu0 %v503_v8 }
 0x23c   :  { %v593_v13 = vpop.f32.mrb[4].mxu0 }
 0x23d   :  { %v594_v14 = vadd.f32 %v710_v12, %v593_v13  ;;  %v920_v15 = vpop.f32.mrb[5].mxu0 }
 0x23f   :  { %v597_v16 = vmax.f32 %v594_v14, 0.0 }
 0x241   :  { %954 = vmatmul.mubr.f32.vlgmr.msra.gmra.mrb[4].mxu1 %v597_v16 }
 0x314   :  { %v687_v18 = vpop.f32.mrb[4].mxu1 }
 0x315   :  { %v688_v19 = vadd.f32 %v711_v17, %v687_v18  ;;  %v955_v20 = vpop.f32.mrb[5].mxu1 }
 0x317   :  { %691 = vst [vmem:[#allocation10] sm:$0xff] %v688_v19 }
 0x318   :  { %1241 = shalt.err (!%p1238_p8)
}
 0x319   :  { %s1242_s9 = scalar_lea.hbm %s1411_s7, 128 }
 0x31a   :  { %p1243_p9 = scmp.ne.s32.totalorder %s1411_s7, %s1242_s9  ;;  %p1246_p10 = scmp.lt.u32.totalorder %s1242_s9, %s1411_s7 }
 0x31c   :  { %p1248_p11 = pnand %p1246_p10, %p1243_p9 }
 0x31e   :  { %1251 = shalt.err (!%p1248_p11)
}
 0x31f   :  { %701 = dma.vmem_to_hbm [thread:$0]  %s699_s29, 128, %s1411_s7, [#allocation4]  }
 0x320   :  { %1258 = dma.done.wait [#allocation4], 128  }
 0x321   :  { %1259 = vsyncadd [#allocation4], 4294967168 }
 0x322   :  { %705 = vsyncpa [#allocation3], 1 }
 0x323   :  { %706 = vsyncpa [#allocation6], 1 }
 0x324   :  { %707 = vsyncpa [#allocation9], 1 }
 0x325   :  { %708 = vsyncpa [#allocation4], 1 }

// kernel: tpu_custom_call.1
= control target key start
LH: loop header
LB: loop body
LE: loop exit
PB: predicated region body
PF: predicated region fallthrough
CT: control target
= control target key end

     0   :  { %12 = vsyncpa [#allocation3], 0  ;;  %s1404_s0 = inlined_call_operand.hbm [shape: f32[8,1024], index: 0, kind: input, shape index: {}]   ;;  %s1405_s1 = inlined_call_operand.hbm [shape: f32[1024,128], index: 1, kind: input, shape index: {}]   ;;  %s1406_s2 = inlined_call_operand.vmem [shape: f32[1,128], index: 2, kind: input, shape index: {}]   ;;  %s1407_s3 = inlined_call_operand.hbm [shape: f32[128,128], index: 3, kind: input, shape index: {}]   ;;  %s1408_s4 = inlined_call_operand.vmem [shape: f32[1,128], index: 4, kind: input, shape index: {}]   ;;  %s1409_s5 = inlined_call_operand.hbm [shape: f32[128,128], index: 5, kind: input, shape index: {}]   ;;  %s1410_s6 = inlined_call_operand.vmem [shape: f32[1,128], index: 6, kind: input, shape index: {}]   ;;  %s1411_s7 = inlined_call_operand.hbm [shape: f32[8,128], index: 7, kind: output, shape index: {}]  }
   0x1   :  { %13 = vsyncpa [#allocation6], 0 }
   0x2   :  { %14 = vsyncpa [#allocation9], 0 }
   0x3   :  { %15 = vsyncpa [#allocation4], 0  ;;  %s1260_s24 = smov [#allocation5]   ;;  %s1142_s28 = scalar_lea.hbm %s1405_s1, 16384 }
   0x4   :  { %s31_s25 = sshll.u32 %s1260_s24, 4  ;;  %p1143_p0 = scmp.ne.s32.totalorder %s1405_s1, %s1142_s28  ;;  %s32_s25 = int_to_ptr.vmem [resolvable:$true] %s31_s25 }
   0x5   :  { %p1146_p1 = scmp.lt.u32.totalorder %s1142_s28, %s1405_s1 }
   0x7   :  { %p1148_p2 = pnand %p1146_p1, %p1143_p0 }
   0x9   :  { %1151 = shalt.err (!%p1148_p2)
}
   0xa   :  { %s1152_s10 = scalar_lea.vmem %s32_s25, 16384  ;;  %p1157_p4 = scmp.lt.s32.totalorder %s32_s25, %s32_s25 }
   0xb   :  { %p1153_p3 = scmp.ne.s32.totalorder %s32_s25, %s1152_s10  ;;  %p1158_p5 = scmp.lt.s32.totalorder %s1152_s10, %s1152_s10 }
   0xd   :  { %p1159_p6 = por %p1158_p5, %p1157_p4 }
   0xf   :  { %p1160_p7 = pnand %p1159_p6, %p1153_p3 }
  0x11   :  { %1163 = shalt.err (!%p1160_p7)
}
  0x12   :  { %s1261_s11 = smov 128   ;;  %s1262_s12 = smov 8  }
  0x13   :  { %37 = dma.hbm_to_vmem [thread:$0]  %s1405_s1, 16384, %s32_s25, [#allocation6], %s1261_s11, %s1261_s11, %s1262_s12  }
  0x14   :  { %s1263_s15 = smov [#allocation2]   ;;  %s1264_s17 = smov [#allocation7]  }
  0x15   :  { %s22_s16 = sshll.u32 %s1263_s15, 4  ;;  %s45_s18 = sshll.u32 %s1264_s17, 4  ;;  %s23_s16 = int_to_ptr.vmem [resolvable:$true] %s22_s16  ;;  %s46_s18 = int_to_ptr.vmem [resolvable:$true] %s45_s18 }
  0x16   :  { %s1164_s21 = scalar_lea.hbm %s1404_s0, 1024 }
  0x17   :  { %p1165_p8 = scmp.ne.s32.totalorder %s1404_s0, %s1164_s21  ;;  %p1168_p9 = scmp.lt.u32.totalorder %s1164_s21, %s1404_s0 }
  0x19   :  { %p1170_p10 = pnand %p1168_p9, %p1165_p8 }
  0x1b   :  { %1173 = shalt.err (!%p1170_p10)
}
  0x1c   :  { %s1174_s1 = scalar_lea.vmem %s23_s16, 1024  ;;  %p1179_p12 = scmp.lt.s32.totalorder %s23_s16, %s23_s16 }
  0x1d   :  { %p1175_p11 = scmp.ne.s32.totalorder %s23_s16, %s1174_s1  ;;  %p1180_p13 = scmp.lt.s32.totalorder %s1174_s1, %s1174_s1 }
  0x1f   :  { %p1181_p0 = por %p1180_p13, %p1179_p12 }
  0x21   :  { %p1182_p1 = pnand %p1181_p0, %p1175_p11 }
  0x23   :  { %1185 = shalt.err (!%p1182_p1)
}
  0x24   :  { %25 = dma.hbm_to_vmem [thread:$0]  %s1404_s0, 1024, %s23_s16, [#allocation3]  }
  0x25   :  { %s1186_s30 = scalar_lea.hbm %s1407_s3, 2048 }
  0x26   :  { %p1187_p2 = scmp.ne.s32.totalorder %s1407_s3, %s1186_s30  ;;  %p1190_p3 = scmp.lt.u32.totalorder %s1186_s30, %s1407_s3 }
  0x28   :  { %p1192_p4 = pnand %p1190_p3, %p1187_p2 }
  0x2a   :  { %1195 = shalt.err (!%p1192_p4)
}
  0x2b   :  { %s1196_s14 = scalar_lea.vmem %s46_s18, 2048  ;;  %p1201_p6 = scmp.lt.s32.totalorder %s46_s18, %s46_s18 }
  0x2c   :  { %p1197_p5 = scmp.ne.s32.totalorder %s46_s18, %s1196_s14  ;;  %p1202_p7 = scmp.lt.s32.totalorder %s1196_s14, %s1196_s14 }
  0x2e   :  { %p1203_p8 = por %p1202_p7, %p1201_p6 }
  0x30   :  { %p1204_p9 = pnand %p1203_p8, %p1197_p5 }
  0x32   :  { %1207 = shalt.err (!%p1204_p9)
}
  0x33   :  { %51 = dma.hbm_to_vmem [thread:$0]  %s1407_s3, 2048, %s46_s18, [#allocation6], %s1261_s11, %s1261_s11, %s1262_s12  }
  0x34   :  { %s1265_s16 = smov [#allocation8]   ;;  %s1208_s21 = scalar_lea.hbm %s1409_s5, 2048 }
  0x35   :  { %s59_s17 = sshll.u32 %s1265_s16, 4  ;;  %p1209_p10 = scmp.ne.s32.totalorder %s1409_s5, %s1208_s21  ;;  %s60_s17 = int_to_ptr.vmem [resolvable:$true] %s59_s17 }
  0x36   :  { %p1212_p11 = scmp.lt.u32.totalorder %s1208_s21, %s1409_s5 }
  0x38   :  { %p1214_p12 = pnand %p1212_p11, %p1209_p10 }
  0x3a   :  { %1217 = shalt.err (!%p1214_p12)
}
  0x3b   :  { %s1218_s1 = scalar_lea.vmem %s60_s17, 2048  ;;  %p1223_p0 = scmp.lt.s32.totalorder %s60_s17, %s60_s17 }
  0x3c   :  { %p1219_p13 = scmp.ne.s32.totalorder %s60_s17, %s1218_s1  ;;  %p1224_p1 = scmp.lt.s32.totalorder %s1218_s1, %s1218_s1 }
  0x3e   :  { %p1225_p2 = por %p1224_p1, %p1223_p0 }
  0x40   :  { %p1226_p3 = pnand %p1225_p2, %p1219_p13 }
  0x42   :  { %1229 = shalt.err (!%p1226_p3)
}
  0x43   :  { %65 = dma.hbm_to_vmem [thread:$0]  %s1409_s5, 2048, %s60_s17, [#allocation9], %s1261_s11, %s1261_s11, %s1262_s12  }
  0x44   :  { %1252 = dma.done.wait [#allocation3], 1024  }
  0x45   :  { %1253 = vsyncadd [#allocation3], 4294966272 }
  0x46   :  { %1254 = dma.done.wait [#allocation6], 18432  }
  0x47   :  { %1255 = vsyncadd [#allocation6], 4294948864 }
  0x48   :  { %1256 = dma.done.wait [#allocation9], 2048  }
  0x49   :  { %1257 = vsyncadd [#allocation9], 4294965248  ;;  %v105_v0 = vld [vmem:[#allocation5 + $0x80] sm:$0xff]  ;;  %v106_v1 = vld [vmem:[#allocation5 + $0x88] sm:$0xff]  ;;  %vm1267_vm0 = vmmov 0   ;;  %s1269_s28 = smov [#allocation10]  }
  0x4a   :  { %v89_v2 = vld [vmem:[#allocation5] sm:$0xff]  ;;  %v956_v3 = vpack.c.bf16 %v106_v1, %v105_v0  ;;  %v90_v4 = vld [vmem:[#allocation5 + $0x8] sm:$0xff]  ;;  %v107_v11 = vld [vmem:[#allocation5 + $0x90] sm:$0xff]  ;;  %s698_s29 = sshll.u32 %s1269_s28, 4  ;;  %s699_s29 = int_to_ptr.vmem [resolvable:$true] %s698_s29 }
  0x4b   :  { %v137_v5 = vld [vmem:[#allocation5 + $0x180] sm:$0xff]  ;;  %v138_v6 = vld [vmem:[#allocation5 + $0x188] sm:$0xff]  ;;  %v958_v7 = vpack.c.bf16 %v90_v4, %v89_v2  ;;  %v108_v13 = vld [vmem:[#allocation5 + $0x98] sm:$0xff]  ;;  %s1230_s30 = scalar_lea.vmem %s699_s29, 128  ;;  %p1235_p5 = scmp.lt.s32.totalorder %s699_s29, %s699_s29 }
  0x4c   :  { %v988_v8 = vpack.c.bf16 %v138_v6, %v137_v5  ;;  %v121_v9 = vld [vmem:[#allocation5 + $0x100] sm:$0xff]  ;;  %v122_v10 = vld [vmem:[#allocation5 + $0x108] sm:$0xff]  ;;  %957 = vmatprep.subr.bf16.mxu0 %v956_v3  ;;  %v91_v14 = vld [vmem:[#allocation5 + $0x10] sm:$0xff]  ;;  %v960_v16 = vpack.c.bf16 %v108_v13, %v107_v11  ;;  %p1231_p4 = scmp.ne.s32.totalorder %s699_s29, %s1230_s30  ;;  %p1236_p6 = scmp.lt.s32.totalorder %s1230_s30, %s1230_s30 }
  0x4d   :  { %v990_v12 = vpack.c.bf16 %v122_v10, %v121_v9  ;;  %v92_v15 = vld [vmem:[#allocation5 + $0x18] sm:$0xff]  ;;  %959 = vmatpush3.bf16.msra.mxu0 %v958_v7  ;;  %v139_v18 = vld [vmem:[#allocation5 + $0x190] sm:$0xff]  ;;  %v109_v23 = vld [vmem:[#allocation5 + $0xa0] sm:$0xff] }
  0x4e   :  { %989 = vmatprep.subr.bf16.mxu1 %v988_v8  ;;  %v962_v17 = vpack.c.bf16 %v92_v15, %v91_v14  ;;  %v140_v19 = vld [vmem:[#allocation5 + $0x198] sm:$0xff]  ;;  %v123_v20 = vld [vmem:[#allocation5 + $0x110] sm:$0xff]  ;;  %v110_v24 = vld [vmem:[#allocation5 + $0xa8] sm:$0xff]  ;;  %961 = vmatprep.subr.bf16.mxu0 %v960_v16  ;;  %p1237_p7 = por %p1236_p6, %p1235_p5 }
  0x4f   :  { %991 = vmatpush3.bf16.msra.mxu1 %v990_v12  ;;  %v992_v21 = vpack.c.bf16 %v140_v19, %v139_v18  ;;  %v124_v22 = vld [vmem:[#allocation5 + $0x118] sm:$0xff]  ;;  %v964_v26 = vpack.c.bf16 %v110_v24, %v109_v23  ;;  %v93_v27 = vld [vmem:[#allocation5 + $0x20] sm:$0xff]  ;;  %v94_v28 = vld [vmem:[#allocation5 + $0x28] sm:$0xff] }
  0x50   :  { %v994_v25 = vpack.c.bf16 %v124_v22, %v123_v20  ;;  %v141_v29 = vld [vmem:[#allocation5 + $0x1a0] sm:$0xff]  ;;  %v142_v30 = vld [vmem:[#allocation5 + $0x1a8] sm:$0xff]  ;;  %v966_v33 = vpack.c.bf16 %v94_v28, %v93_v27  ;;  %v111_v35 = vld [vmem:[#allocation5 + $0xb0] sm:$0xff]  ;;  %p1238_p8 = pnand %p1237_p7, %p1231_p4 }
  0x51   :  { %993 = vmatprep.subr.bf16.mxu1 %v992_v21  ;;  %v125_v31 = vld [vmem:[#allocation5 + $0x120] sm:$0xff]  ;;  %v126_v32 = vld [vmem:[#allocation5 + $0x128] sm:$0xff]  ;;  %963 = vmatpush3.bf16.msra.mxu0 %v962_v17  ;;  %v996_v34 = vpack.c.bf16 %v142_v30, %v141_v29  ;;  %v112_v36 = vld [vmem:[#allocation5 + $0xb8] sm:$0xff] }
  0x52   :  { %v95_v37 = vld [vmem:[#allocation5 + $0x30] sm:$0xff]  ;;  %965 = vmatprep.subr.bf16.mxu0 %v964_v26  ;;  %v998_v38 = vpack.c.bf16 %v126_v32, %v125_v31  ;;  %v968_v39 = vpack.c.bf16 %v112_v36, %v111_v35  ;;  %v96_v40 = vld [vmem:[#allocation5 + $0x38] sm:$0xff]  ;;  %v113_v46 = vld [vmem:[#allocation5 + $0xc0] sm:$0xff] }
  0x53   :  { %995 = vmatpush3.bf16.msra.mxu1 %v994_v25  ;;  %v143_v41 = vld [vmem:[#allocation5 + $0x1b0] sm:$0xff]  ;;  %v144_v42 = vld [vmem:[#allocation5 + $0x1b8] sm:$0xff]  ;;  %v114_v47 = vld [vmem:[#allocation5 + $0xc8] sm:$0xff]  ;;  %v970_v48 = vpack.c.bf16 %v96_v40, %v95_v37 }
  0x54   :  { %997 = vmatprep.subr.bf16.mxu1 %v996_v34  ;;  %v1000_v43 = vpack.c.bf16 %v144_v42, %v143_v41  ;;  %v127_v44 = vld [vmem:[#allocation5 + $0x130] sm:$0xff]  ;;  %v128_v45 = vld [vmem:[#allocation5 + $0x138] sm:$0xff]  ;;  %v145_v49 = vld [vmem:[#allocation5 + $0x1c0] sm:$0xff]  ;;  %v972_v52 = vpack.c.bf16 %v114_v47, %v113_v46 }
  0x55   :  { %967 = vmatpush3.bf16.msra.mxu0 %v966_v33  ;;  %v146_v50 = vld [vmem:[#allocation5 + $0x1c8] sm:$0xff]  ;;  %v1002_v51 = vpack.c.bf16 %v128_v45, %v127_v44  ;;  %v97_v53 = vld [vmem:[#allocation5 + $0x40] sm:$0xff]  ;;  %v115_v58 = vld [vmem:[#allocation5 + $0xd0] sm:$0xff] }
  0x56   :  { %969 = vmatprep.subr.bf16.mxu0 %v968_v39  ;;  %v98_v54 = vld [vmem:[#allocation5 + $0x48] sm:$0xff]  ;;  %v129_v55 = vld [vmem:[#allocation5 + $0x140] sm:$0xff]  ;;  %v1004_v56 = vpack.c.bf16 %v146_v50, %v145_v49  ;;  %v116_v59 = vld [vmem:[#allocation5 + $0xd8] sm:$0xff] }
  0x57   :  { %999 = vmatpush3.bf16.msra.mxu1 %v998_v38  ;;  %v130_v57 = vld [vmem:[#allocation5 + $0x148] sm:$0xff]  ;;  %v147_v60 = vld [vmem:[#allocation5 + $0x1d0] sm:$0xff]  ;;  %v148_v61 = vld [vmem:[#allocation5 + $0x1d8] sm:$0xff]  ;;  %v974_v62 = vpack.c.bf16 %v98_v54, %v97_v53  ;;  %v976_v0 = vpack.c.bf16 %v116_v59, %v115_v58 }
  0x58   :  { %1001 = vmatprep.subr.bf16.mxu1 %v1000_v43  ;;  %v1006_v63 = vpack.c.bf16 %v130_v57, %v129_v55  ;;  %v99_v1 = vld [vmem:[#allocation5 + $0x50] sm:$0xff]  ;;  %v100_v2 = vld [vmem:[#allocation5 + $0x58] sm:$0xff]  ;;  %v1008_v4 = vpack.c.bf16 %v148_v61, %v147_v60  ;;  %v117_v6 = vld [vmem:[#allocation5 + $0xe0] sm:$0xff] }
  0x59   :  { %971 = vmatpush3.bf16.msra.mxu0 %v970_v48  ;;  %v131_v3 = vld [vmem:[#allocation5 + $0x150] sm:$0xff]  ;;  %v132_v5 = vld [vmem:[#allocation5 + $0x158] sm:$0xff]  ;;  %v118_v7 = vld [vmem:[#allocation5 + $0xe8] sm:$0xff]  ;;  %v978_v10 = vpack.c.bf16 %v100_v2, %v99_v1 }
  0x5a   :  { %973 = vmatprep.subr.bf16.mxu0 %v972_v52  ;;  %v149_v8 = vld [vmem:[#allocation5 + $0x1e0] sm:$0xff]  ;;  %v150_v9 = vld [vmem:[#allocation5 + $0x1e8] sm:$0xff]  ;;  %v1010_v13 = vpack.c.bf16 %v132_v5, %v131_v3  ;;  %v980_v14 = vpack.c.bf16 %v118_v7, %v117_v6  ;;  %v119_v19 = vld [vmem:[#allocation5 + $0xf0] sm:$0xff] }
  0x5b   :  { %1003 = vmatpush3.bf16.msra.mxu1 %v1002_v51  ;;  %v101_v11 = vld [vmem:[#allocation5 + $0x60] sm:$0xff]  ;;  %v102_v12 = vld [vmem:[#allocation5 + $0x68] sm:$0xff]  ;;  %v1012_v18 = vpack.c.bf16 %v150_v9, %v149_v8  ;;  %v120_v20 = vld [vmem:[#allocation5 + $0xf8] sm:$0xff] }
  0x5c   :  { %1005 = vmatprep.subr.bf16.mxu1 %v1004_v56  ;;  %v133_v15 = vld [vmem:[#allocation5 + $0x160] sm:$0xff]  ;;  %v134_v16 = vld [vmem:[#allocation5 + $0x168] sm:$0xff]  ;;  %v83_v21 = vld [vmem:[#allocation2 + $0x18] sm:$0xff]  ;;  %v982_v24 = vpack.c.bf16 %v102_v12, %v101_v11  ;;  %v984_v26 = vpack.c.bf16 %v120_v20, %v119_v19 }
  0x5d   :  { %975 = vmatpush3.bf16.msra.mxu0 %v974_v62  ;;  %v81_v17 = vld [vmem:[#allocation2 + $0x8] sm:$0xff]  ;;  %v151_v22 = vld [vmem:[#allocation5 + $0x1f0] sm:$0xff]  ;;  %v152_v23 = vld [vmem:[#allocation5 + $0x1f8] sm:$0xff]  ;;  %357 = vmatprep.mubr.f32.mxu1 %v83_v21  ;;  %v1014_v25 = vpack.c.bf16 %v134_v16, %v133_v15 }
  0x5e   :  { %977 = vmatprep.subr.bf16.mxu0 %v976_v0  ;;  %287 = vmatprep.mubr.f32.mxu0 %v81_v17  ;;  %v103_v27 = vld [vmem:[#allocation5 + $0x70] sm:$0xff]  ;;  %v104_v28 = vld [vmem:[#allocation5 + $0x78] sm:$0xff]  ;;  %v1016_v30 = vpack.c.bf16 %v152_v23, %v151_v22  ;;  %v169_v32 = vld [vmem:[#allocation5 + $0x280] sm:$0xff] }
  0x5f   :  { %1007 = vmatpush3.bf16.msra.mxu1 %v1006_v63  ;;  %v135_v29 = vld [vmem:[#allocation5 + $0x170] sm:$0xff]  ;;  %v136_v31 = vld [vmem:[#allocation5 + $0x178] sm:$0xff]  ;;  %v170_v33 = vld [vmem:[#allocation5 + $0x288] sm:$0xff]  ;;  %v986_v36 = vpack.c.bf16 %v104_v28, %v103_v27 }
  0x60   :  { %1009 = vmatprep.subr.bf16.mxu1 %v1008_v4  ;;  %v201_v34 = vld [vmem:[#allocation5 + $0x380] sm:$0xff]  ;;  %v202_v35 = vld [vmem:[#allocation5 + $0x388] sm:$0xff]  ;;  %v1018_v37 = vpack.c.bf16 %v136_v31, %v135_v29  ;;  %v1020_v38 = vpack.c.bf16 %v170_v33, %v169_v32  ;;  %v171_v44 = vld [vmem:[#allocation5 + $0x290] sm:$0xff] }
  0x61   :  { %979 = vmatpush3.bf16.msra.mxu0 %v978_v10  ;;  %v153_v39 = vld [vmem:[#allocation5 + $0x200] sm:$0xff]  ;;  %v154_v40 = vld [vmem:[#allocation5 + $0x208] sm:$0xff]  ;;  %v1052_v42 = vpack.c.bf16 %v202_v35, %v201_v34  ;;  %v172_v45 = vld [vmem:[#allocation5 + $0x298] sm:$0xff] }
  0x62   :  { %981 = vmatprep.subr.bf16.mxu0 %v980_v14  ;;  %v185_v41 = vld [vmem:[#allocation5 + $0x300] sm:$0xff]  ;;  %v186_v43 = vld [vmem:[#allocation5 + $0x308] sm:$0xff]  ;;  %v203_v46 = vld [vmem:[#allocation5 + $0x390] sm:$0xff]  ;;  %v1022_v49 = vpack.c.bf16 %v154_v40, %v153_v39  ;;  %v1024_v52 = vpack.c.bf16 %v172_v45, %v171_v44 }
  0x63   :  { %1011 = vmatpush3.bf16.msra.mxu1 %v1010_v13  ;;  %v204_v47 = vld [vmem:[#allocation5 + $0x398] sm:$0xff]  ;;  %v80_v48 = vld [vmem:[#allocation2] sm:$0xff]  ;;  %v82_v50 = vld [vmem:[#allocation2 + $0x10] sm:$0xff]  ;;  %v1054_v51 = vpack.c.bf16 %v186_v43, %v185_v41 }
  0x64   :  { %1013 = vmatprep.subr.bf16.mxu1 %v1012_v18  ;;  %v155_v53 = vld [vmem:[#allocation5 + $0x210] sm:$0xff]  ;;  %v156_v54 = vld [vmem:[#allocation5 + $0x218] sm:$0xff]  ;;  %v1056_v56 = vpack.c.bf16 %v204_v47, %v203_v46  ;;  %v173_v58 = vld [vmem:[#allocation5 + $0x2a0] sm:$0xff] }
  0x65   :  { %983 = vmatpush3.bf16.msra.mxu0 %v982_v24  ;;  %v187_v55 = vld [vmem:[#allocation5 + $0x310] sm:$0xff]  ;;  %v188_v57 = vld [vmem:[#allocation5 + $0x318] sm:$0xff]  ;;  %v174_v59 = vld [vmem:[#allocation5 + $0x2a8] sm:$0xff]  ;;  %v1026_v62 = vpack.c.bf16 %v156_v54, %v155_v53 }
  0x66   :  { %985 = vmatprep.subr.bf16.mxu0 %v984_v26  ;;  %v205_v60 = vld [vmem:[#allocation5 + $0x3a0] sm:$0xff]  ;;  %v206_v61 = vld [vmem:[#allocation5 + $0x3a8] sm:$0xff]  ;;  %v1058_v63 = vpack.c.bf16 %v188_v57, %v187_v55  ;;  %v1028_v0 = vpack.c.bf16 %v174_v59, %v173_v58  ;;  %v175_v6 = vld [vmem:[#allocation5 + $0x2b0] sm:$0xff] }
  0x67   :  { %1015 = vmatpush3.bf16.msra.mxu1 %v1014_v25  ;;  %v157_v1 = vld [vmem:[#allocation5 + $0x220] sm:$0xff]  ;;  %v158_v2 = vld [vmem:[#allocation5 + $0x228] sm:$0xff]  ;;  %v1060_v4 = vpack.c.bf16 %v206_v61, %v205_v60  ;;  %v176_v7 = vld [vmem:[#allocation5 + $0x2b8] sm:$0xff] }
  0x68   :  { %1017 = vmatprep.subr.bf16.mxu1 %v1016_v30  ;;  %v189_v3 = vld [vmem:[#allocation5 + $0x320] sm:$0xff]  ;;  %v190_v5 = vld [vmem:[#allocation5 + $0x328] sm:$0xff]  ;;  %v207_v8 = vld [vmem:[#allocation5 + $0x3b0] sm:$0xff]  ;;  %v1030_v10 = vpack.c.bf16 %v158_v2, %v157_v1  ;;  %v1032_v12 = vpack.c.bf16 %v176_v7, %v175_v6 }
  0x69   :  { %987 = vmatpush3.bf16.msra.mxu0 %v986_v36  ;;  %v208_v9 = vld [vmem:[#allocation5 + $0x3b8] sm:$0xff]  ;;  %v1062_v11 = vpack.c.bf16 %v190_v5, %v189_v3  ;;  %v159_v13 = vld [vmem:[#allocation5 + $0x230] sm:$0xff]  ;;  %v177_v18 = vld [vmem:[#allocation5 + $0x2c0] sm:$0xff] }
  0x6a   :  { %1021 = vmatprep.subr.bf16.mxu0 %v1020_v38  ;;  %v160_v14 = vld [vmem:[#allocation5 + $0x238] sm:$0xff]  ;;  %v191_v15 = vld [vmem:[#allocation5 + $0x330] sm:$0xff]  ;;  %v1064_v16 = vpack.c.bf16 %v208_v9, %v207_v8  ;;  %v178_v19 = vld [vmem:[#allocation5 + $0x2c8] sm:$0xff] }
  0x6b   :  { %1019 = vmatpush3.bf16.msra.mxu1 %v1018_v37  ;;  %v192_v17 = vld [vmem:[#allocation5 + $0x338] sm:$0xff]  ;;  %v209_v20 = vld [vmem:[#allocation5 + $0x3c0] sm:$0xff]  ;;  %v210_v21 = vld [vmem:[#allocation5 + $0x3c8] sm:$0xff]  ;;  %v1034_v22 = vpack.c.bf16 %v160_v14, %v159_v13  ;;  %v1036_v26 = vpack.c.bf16 %v178_v19, %v177_v18 }
  0x6c   :  { %1053 = vmatprep.subr.bf16.mxu1 %v1052_v42  ;;  %288 = vmatmul.mubr.f32.vlgmr.msra.gmra.mrb[0].mxu0 %v80_v48  ;;  %v85_v23 = vld [vmem:[#allocation2 + $0x28] sm:$0xff]  ;;  %v87_v24 = vld [vmem:[#allocation2 + $0x38] sm:$0xff]  ;;  %v1066_v25 = vpack.c.bf16 %v192_v17, %v191_v15  ;;  %v161_v27 = vld [vmem:[#allocation5 + $0x240] sm:$0xff]  ;;  %v1068_v30 = vpack.c.bf16 %v210_v21, %v209_v20 }
  0x6d   :  { %1023 = vmatpush3.bf16.msra.mxu0 %v1022_v49  ;;  %v162_v28 = vld [vmem:[#allocation5 + $0x248] sm:$0xff]  ;;  %v193_v29 = vld [vmem:[#allocation5 + $0x340] sm:$0xff]  ;;  %v179_v32 = vld [vmem:[#allocation5 + $0x2d0] sm:$0xff]  ;;  %427 = vmatprep.mubr.f32.mxu0 %v85_v23 }
  0x6e   :  { %358 = vmatmul.mubr.f32.vlgmr.msra.gmra.mrb[0].mxu1 %v82_v50  ;;  %1025 = vmatprep.subr.bf16.mxu0 %v1024_v52  ;;  %v194_v31 = vld [vmem:[#allocation5 + $0x348] sm:$0xff]  ;;  %v180_v33 = vld [vmem:[#allocation5 + $0x2d8] sm:$0xff]  ;;  %v211_v34 = vld [vmem:[#allocation5 + $0x3d0] sm:$0xff]  ;;  %v1038_v36 = vpack.c.bf16 %v162_v28, %v161_v27 }
  0x6f   :  { %1055 = vmatpush3.bf16.msra.mxu1 %v1054_v51  ;;  %v212_v35 = vld [vmem:[#allocation5 + $0x3d8] sm:$0xff]  ;;  %497 = vmatprep.mubr.f32.mxu1 %v87_v24  ;;  %v1070_v37 = vpack.c.bf16 %v194_v31, %v193_v29  ;;  %v1040_v38 = vpack.c.bf16 %v180_v33, %v179_v32  ;;  %v163_v39 = vld [vmem:[#allocation5 + $0x250] sm:$0xff]  ;;  %v181_v44 = vld [vmem:[#allocation5 + $0x2e0] sm:$0xff]  ;;  %v1268_v33 = vmov 0.0  }
  0x70   :  { %1057 = vmatprep.subr.bf16.mxu1 %v1056_v56  ;;  %v164_v40 = vld [vmem:[#allocation5 + $0x258] sm:$0xff]  ;;  %v195_v41 = vld [vmem:[#allocation5 + $0x350] sm:$0xff]  ;;  %v1072_v42 = vpack.c.bf16 %v212_v35, %v211_v34  ;;  %v182_v45 = vld [vmem:[#allocation5 + $0x2e8] sm:$0xff] }
  0x71   :  { %1027 = vmatpush3.bf16.msra.mxu0 %v1026_v62  ;;  %v196_v43 = vld [vmem:[#allocation5 + $0x358] sm:$0xff]  ;;  %v213_v46 = vld [vmem:[#allocation5 + $0x3e0] sm:$0xff]  ;;  %v214_v47 = vld [vmem:[#allocation5 + $0x3e8] sm:$0xff]  ;;  %v1042_v48 = vpack.c.bf16 %v164_v40, %v163_v39  ;;  %v1044_v50 = vpack.c.bf16 %v182_v45, %v181_v44 }
  0x72   :  { %1029 = vmatprep.subr.bf16.mxu0 %v1028_v0  ;;  %v1074_v49 = vpack.c.bf16 %v196_v43, %v195_v41  ;;  %v165_v51 = vld [vmem:[#allocation5 + $0x260] sm:$0xff]  ;;  %v166_v52 = vld [vmem:[#allocation5 + $0x268] sm:$0xff]  ;;  %v1076_v54 = vpack.c.bf16 %v214_v47, %v213_v46  ;;  %v183_v56 = vld [vmem:[#allocation5 + $0x2f0] sm:$0xff] }
  0x73   :  { %1059 = vmatpush3.bf16.msra.mxu1 %v1058_v63  ;;  %v197_v53 = vld [vmem:[#allocation5 + $0x360] sm:$0xff]  ;;  %v198_v55 = vld [vmem:[#allocation5 + $0x368] sm:$0xff]  ;;  %v184_v57 = vld [vmem:[#allocation5 + $0x2f8] sm:$0xff]  ;;  %v1046_v60 = vpack.c.bf16 %v166_v52, %v165_v51 }
  0x74   :  { %1061 = vmatprep.subr.bf16.mxu1 %v1060_v4  ;;  %v215_v58 = vld [vmem:[#allocation5 + $0x3f0] sm:$0xff]  ;;  %v216_v59 = vld [vmem:[#allocation5 + $0x3f8] sm:$0xff]  ;;  %v1078_v61 = vpack.c.bf16 %v198_v55, %v197_v53  ;;  %v1048_v62 = vpack.c.bf16 %v184_v57, %v183_v56  ;;  %v84_v6 = vld [vmem:[#allocation2 + $0x20] sm:$0xff] }
  0x75   :  { %1031 = vmatpush3.bf16.msra.mxu0 %v1030_v10  ;;  %v167_v63 = vld [vmem:[#allocation5 + $0x270] sm:$0xff]  ;;  %v168_v0 = vld [vmem:[#allocation5 + $0x278] sm:$0xff]  ;;  %v1080_v1 = vpack.c.bf16 %v216_v59, %v215_v58  ;;  %v505_v8 = vld [vmem:[#allocation7] sm:$0xff] }
  0x76   :  { %1033 = vmatprep.subr.bf16.mxu0 %v1032_v12  ;;  %v199_v2 = vld [vmem:[#allocation5 + $0x370] sm:$0xff]  ;;  %v200_v3 = vld [vmem:[#allocation5 + $0x378] sm:$0xff]  ;;  %v1050_v4 = vpack.c.bf16 %v168_v0, %v167_v63  ;;  %v506_v9 = vld [vmem:[#allocation7 + $0x8] sm:$0xff] }
  0x77   :  { %1063 = vmatpush3.bf16.msra.mxu1 %v1062_v11  ;;  %v1082_v5 = vpack.c.bf16 %v200_v3, %v199_v2  ;;  %v86_v7 = vld [vmem:[#allocation2 + $0x30] sm:$0xff]  ;;  %v1266_v11 = vmov 0.0|0.0   ;;  %v1085_v12 = vpack.c.bf16 %v506_v9, %v505_v8  ;;  %v508_v13 = vld [vmem:[#allocation7 + $0x18] sm:$0xff]  ;;  %v509_v15 = vld [vmem:[#allocation7 + $0x20] sm:$0xff] }
  0x78   :  { %1065 = vmatprep.subr.bf16.mxu1 %v1064_v16  ;;  %v507_v10 = vld [vmem:[#allocation7 + $0x10] sm:$0xff]  ;;  %v510_v16 = vld [vmem:[#allocation7 + $0x28] sm:$0xff]  ;;  %v512_v19 = vld [vmem:[#allocation7 + $0x38] sm:$0xff] }
  0x79   :  { %1035 = vmatpush3.bf16.msra.mxu0 %v1034_v22  ;;  %v1088_v14 = vpack.c.bf16 %v508_v13, %v507_v10  ;;  %v1091_v17 = vpack.c.bf16 %v510_v16, %v509_v15  ;;  %v511_v18 = vld [vmem:[#allocation7 + $0x30] sm:$0xff]  ;;  %v513_v21 = vld [vmem:[#allocation7 + $0x40] sm:$0xff]  ;;  %v514_v22 = vld [vmem:[#allocation7 + $0x48] sm:$0xff] }
  0x7a   :  { %1037 = vmatprep.subr.bf16.mxu0 %v1036_v26  ;;  %v1094_v20 = vpack.c.bf16 %v512_v19, %v511_v18  ;;  %v1097_v23 = vpack.c.bf16 %v514_v22, %v513_v21  ;;  %v515_v24 = vld [vmem:[#allocation7 + $0x50] sm:$0xff]  ;;  %v517_v27 = vld [vmem:[#allocation7 + $0x60] sm:$0xff]  ;;  %v518_v28 = vld [vmem:[#allocation7 + $0x68] sm:$0xff] }
  0x7b   :  { %1067 = vmatpush3.bf16.msra.mxu1 %v1066_v25  ;;  %v516_v25 = vld [vmem:[#allocation7 + $0x58] sm:$0xff]  ;;  %v1103_v29 = vpack.c.bf16 %v518_v28, %v517_v27  ;;  %v599_v34 = vld [vmem:[#allocation8] sm:$0xff]  ;;  %v600_v35 = vld [vmem:[#allocation8 + $0x8] sm:$0xff] }
  0x7c   :  { %1069 = vmatprep.subr.bf16.mxu1 %v1068_v30  ;;  %v1100_v26 = vpack.c.bf16 %v516_v25, %v515_v24  ;;  %v519_v30 = vld [vmem:[#allocation7 + $0x70] sm:$0xff]  ;;  %v520_v31 = vld [vmem:[#allocation7 + $0x78] sm:$0xff]  ;;  %v603_v40 = vld [vmem:[#allocation8 + $0x20] sm:$0xff] }
  0x7d   :  { %1039 = vmatpush3.bf16.msra.mxu0 %v1038_v36  ;;  %v1106_v32 = vpack.c.bf16 %v520_v31, %v519_v30  ;;  %v601_v36 = vld [vmem:[#allocation8 + $0x10] sm:$0xff]  ;;  %v604_v41 = vld [vmem:[#allocation8 + $0x28] sm:$0xff]  ;;  %v606_v44 = vld [vmem:[#allocation8 + $0x38] sm:$0xff] }
  0x7e   :  { %1041 = vmatprep.subr.bf16.mxu0 %v1040_v38  ;;  %v602_v38 = vld [vmem:[#allocation8 + $0x18] sm:$0xff]  ;;  %v605_v43 = vld [vmem:[#allocation8 + $0x30] sm:$0xff]  ;;  %v607_v46 = vld [vmem:[#allocation8 + $0x40] sm:$0xff] }
  0x7f   :  { %1071 = vmatpush3.bf16.msra.mxu1 %v1070_v37  ;;  %v1109_v37 = vpack.c.bf16 %v600_v35, %v599_v34  ;;  %v1112_v39 = vpack.c.bf16 %v602_v38, %v601_v36  ;;  %v1118_v45 = vpack.c.bf16 %v606_v44, %v605_v43  ;;  %v608_v47 = vld [vmem:[#allocation8 + $0x48] sm:$0xff]  ;;  %v611_v52 = vld [vmem:[#allocation8 + $0x60] sm:$0xff]  ;;  %v613_v9 = vld [vmem:[#allocation8 + $0x70] sm:$0xff] }
  0x80   :  { %1073 = vmatprep.subr.bf16.mxu1 %v1072_v42  ;;  %v1115_v42 = vpack.c.bf16 %v604_v41, %v603_v40  ;;  %v612_v53 = vld [vmem:[#allocation8 + $0x68] sm:$0xff]  ;;  %v709_v56 = vld [vmem:[%s1406_s2] ss:$0 sm:$0xff]  ;;  %v614_v10 = vld [vmem:[#allocation8 + $0x78] sm:$0xff] }
  0x81   :  { %1043 = vmatpush3.bf16.msra.mxu0 %v1042_v48  ;;  %v1121_v48 = vpack.c.bf16 %v608_v47, %v607_v46 }
  0x82   :  { %1045 = vmatprep.subr.bf16.mxu0 %v1044_v50  ;;  %v610_v50 = vld [vmem:[#allocation8 + $0x58] sm:$0xff] }
  0x83   :  { %1075 = vmatpush3.bf16.msra.mxu1 %v1074_v49  ;;  %v609_v49 = vld [vmem:[#allocation8 + $0x50] sm:$0xff] }
  0x84   :  { %1077 = vmatprep.subr.bf16.mxu1 %v1076_v54  ;;  %v1124_v51 = vpack.c.bf16 %v610_v50, %v609_v49  ;;  %v1127_v54 = vpack.c.bf16 %v612_v53, %v611_v52 }
  0x85   :  { %1047 = vmatpush3.bf16.msra.mxu0 %v1046_v60 }
  0x86   :  { %1049 = vmatprep.subr.bf16.mxu0 %v1048_v62 }
  0x87   :  { %1079 = vmatpush3.bf16.msra.mxu1 %v1078_v61 }
  0x88   :  { %1081 = vmatprep.subr.bf16.mxu1 %v1080_v1 }
  0x89   :  { %1051 = vmatpush3.bf16.msra.mxu0 %v1050_v4 }
  0x8a   :  { %1084 = vmatprep.subr.bf16.mxu0 %v1266_v11 }
  0x8b   :  { %1083 = vmatpush3.bf16.msra.mxu1 %v1082_v5 }
  0x8c   :  { %428 = vmatmul.mubr.f32.vlgmr.msra.gmra.mrb[2].mxu0 %v84_v6  ;;  %1108 = vmatprep.subr.bf16.mxu1 %v1266_v11 }
  0x8d   :  { %1086 = vmatpush3.bf16.msra.mxu0 %v1085_v12  ;;  %918 = vmatprep.mubr.msk.f32.mxu0 %vm1267_vm0, %v1268_v33  ;;  %v710_v12 = vld [vmem:[%s1408_s4] ss:$0 sm:$0xff] }
  0x8e   :  { %498 = vmatmul.mubr.f32.vlgmr.msra.gmra.mrb[2].mxu1 %v86_v7  ;;  %1087 = vmatprep.subr.bf16.mxu0 %v1266_v11 }
  0x8f   :  { %953 = vmatprep.mubr.msk.f32.mxu1 %vm1267_vm0, %v1268_v33  ;;  %1110 = vmatpush3.bf16.msra.mxu1 %v1109_v37 }
  0x90   :  { %1111 = vmatprep.subr.bf16.mxu1 %v1266_v11 }
  0x91   :  { %1089 = vmatpush3.bf16.msra.mxu0 %v1088_v14 }
  0x92   :  { %1090 = vmatprep.subr.bf16.mxu0 %v1266_v11 }
  0x93   :  { %1113 = vmatpush3.bf16.msra.mxu1 %v1112_v39 }
  0x94   :  { %1114 = vmatprep.subr.bf16.mxu1 %v1266_v11 }
  0x95   :  { %1092 = vmatpush3.bf16.msra.mxu0 %v1091_v17  ;;  %v711_v17 = vld [vmem:[%s1410_s6] ss:$0 sm:$0xff] }
  0x96   :  { %1093 = vmatprep.subr.bf16.mxu0 %v1266_v11 }
  0x97   :  { %1116 = vmatpush3.bf16.msra.mxu1 %v1115_v42 }
  0x98   :  { %1117 = vmatprep.subr.bf16.mxu1 %v1266_v11 }
  0x99   :  { %1095 = vmatpush3.bf16.msra.mxu0 %v1094_v20 }
  0x9a   :  { %1096 = vmatprep.subr.bf16.mxu0 %v1266_v11 }
  0x9b   :  { %1119 = vmatpush3.bf16.msra.mxu1 %v1118_v45 }
  0x9c   :  { %1120 = vmatprep.subr.bf16.mxu1 %v1266_v11 }
  0x9d   :  { %1098 = vmatpush3.bf16.msra.mxu0 %v1097_v23 }
  0x9e   :  { %1099 = vmatprep.subr.bf16.mxu0 %v1266_v11 }
  0x9f   :  { %1122 = vmatpush3.bf16.msra.mxu1 %v1121_v48 }
  0xa0   :  { %1123 = vmatprep.subr.bf16.mxu1 %v1266_v11 }
  0xa1   :  { %1101 = vmatpush3.bf16.msra.mxu0 %v1100_v26 }
  0xa2   :  { %1102 = vmatprep.subr.bf16.mxu0 %v1266_v11 }
  0xa3   :  { %1125 = vmatpush3.bf16.msra.mxu1 %v1124_v51 }
  0xa4   :  { %1126 = vmatprep.subr.bf16.mxu1 %v1266_v11 }
  0xa5   :  { %1104 = vmatpush3.bf16.msra.mxu0 %v1103_v29 }
  0xa6   :  { %1105 = vmatprep.subr.bf16.mxu0 %v1266_v11 }
  0xa7   :  { %1128 = vmatpush3.bf16.msra.mxu1 %v1127_v54 }
  0xa8   :  { %1129 = vmatprep.subr.bf16.mxu1 %v1266_v11  ;;  %v1130_v11 = vpack.c.bf16 %v614_v10, %v613_v9 }
  0xa9   :  { %1107 = vmatpush3.bf16.msra.mxu0 %v1106_v32 }
  0xab   :  { %1131 = vmatpush3.bf16.msra.mxu1 %v1130_v11 }
 0x13f   :  { %v744_v55 = vpop.f32.mrb[0].mxu0 }
 0x140   :  { %v745_v57 = vpop.f32.mrb[1].mxu0 }
 0x141   :  { %v779_v58 = vpop.f32.mrb[0].mxu1  ;;  %v746_v59 = vadd.f32 %v745_v57, %v744_v55 }
 0x142   :  { %v780_v60 = vpop.f32.mrb[1].mxu1 }
 0x143   :  { %v781_v61 = vadd.f32 %v780_v60, %v779_v58  ;;  %v290_v62 = vadd.f32 %v746_v59, %v709_v56 }
 0x145   :  { %v360_v63 = vadd.f32 %v781_v61, %v290_v62 }
 0x15f   :  { %v814_v0 = vpop.f32.mrb[2].mxu0 }
 0x160   :  { %v815_v1 = vpop.f32.mrb[3].mxu0 }
 0x161   :  { %v849_v2 = vpop.f32.mrb[2].mxu1  ;;  %v816_v3 = vadd.f32 %v815_v1, %v814_v0 }
 0x162   :  { %v850_v4 = vpop.f32.mrb[3].mxu1 }
 0x163   :  { %v851_v5 = vadd.f32 %v850_v4, %v849_v2  ;;  %v430_v6 = vadd.f32 %v816_v3, %v360_v63 }
 0x165   :  { %v500_v7 = vadd.f32 %v851_v5, %v430_v6 }
 0x167   :  { %v503_v8 = vmax.f32 %v500_v7, 0.0 }
 0x169   :  { %919 = vmatmul.mubr.f32.vlgmr.msra.gmra.mrb[4].mxu0 %v503_v8 }
 0x23c   :  { %v593_v13 = vpop.f32.mrb[4].mxu0 }
 0x23d   :  { %v594_v14 = vadd.f32 %v710_v12, %v593_v13  ;;  %v920_v15 = vpop.f32.mrb[5].mxu0 }
 0x23f   :  { %v597_v16 = vmax.f32 %v594_v14, 0.0 }
 0x241   :  { %954 = vmatmul.mubr.f32.vlgmr.msra.gmra.mrb[4].mxu1 %v597_v16 }
 0x314   :  { %v687_v18 = vpop.f32.mrb[4].mxu1 }
 0x315   :  { %v688_v19 = vadd.f32 %v711_v17, %v687_v18  ;;  %v955_v20 = vpop.f32.mrb[5].mxu1 }
 0x317   :  { %691 = vst [vmem:[#allocation10] sm:$0xff] %v688_v19 }
 0x318   :  { %1241 = shalt.err (!%p1238_p8)
}
 0x319   :  { %s1242_s9 = scalar_lea.hbm %s1411_s7, 128 }
 0x31a   :  { %p1243_p9 = scmp.ne.s32.totalorder %s1411_s7, %s1242_s9  ;;  %p1246_p10 = scmp.lt.u32.totalorder %s1242_s9, %s1411_s7 }
 0x31c   :  { %p1248_p11 = pnand %p1246_p10, %p1243_p9 }
 0x31e   :  { %1251 = shalt.err (!%p1248_p11)
}
 0x31f   :  { %701 = dma.vmem_to_hbm [thread:$0]  %s699_s29, 128, %s1411_s7, [#allocation4]  }
 0x320   :  { %1258 = dma.done.wait [#allocation4], 128  }
 0x321   :  { %1259 = vsyncadd [#allocation4], 4294967168 }
 0x322   :  { %705 = vsyncpa [#allocation3], 1 }
 0x323   :  { %706 = vsyncpa [#allocation6], 1 }
 0x324   :  { %707 = vsyncpa [#allocation9], 1 }
 0x325   :  { %708 = vsyncpa [#allocation4], 1 }

</bundles_post_ra>
